<compile_context>
chip_gen: v7x
topology: tpu7x:2x2x1
jax: 0.10.0
libtpu: 0.0.40
codegen_flags: <defaults>
</compile_context>

<pallas_src>
import functools

import jax
import jax.numpy as jnp
import numpy as np
from jax.experimental import pallas as pl
from jax.experimental.pallas import tpu as pltpu


def _mha_kernel(xq_ref, xk_ref, xv_ref, wqt_ref, wkt_ref, wvt_ref, mask_ref,
                wht_ref, whb_ref, wh1t_ref, wh1b_ref,
                a_ref, h_ref, h1_ref, *, num_heads, d_k):
    # xq/xk/xv refs: (1, S, D); w*t refs: (D, D) already transposed (and W_q^T
    # pre-scaled by 1/sqrt(d_k)); mask ref: (S, S); bias refs: (1, D).
    xq = xq_ref[0]
    xk = xk_ref[0]
    xv = xv_ref[0]

    # Full-width projections for all heads at once (MXU N = D, not d_k).
    q_all = jnp.dot(xq, wqt_ref[...], preferred_element_type=jnp.float32)  # (S, D), pre-scaled
    k_all = jnp.dot(xk, wkt_ref[...], preferred_element_type=jnp.float32)  # (S, D)
    v_all = jnp.dot(xv, wvt_ref[...], preferred_element_type=jnp.float32)  # (S, D)

    mask = mask_ref[...]                                                   # (S, S)

    h_heads = []
    h1_heads = []
    for h in range(num_heads):                       # static unrolled loop over heads
        lo = h * d_k
        q = q_all[:, lo:lo + d_k]                    # (S, d_k)  (already scaled)
        k = k_all[:, lo:lo + d_k]
        v = v_all[:, lo:lo + d_k]

        # scores = q @ k^T without an explicit in-kernel transpose.
        scores = jax.lax.dot_general(
            q, k, dimension_numbers=(((1,), (1,)), ((), ())),
            preferred_element_type=jnp.float32) + mask                     # (S, S)

        m = jnp.max(scores, axis=-1, keepdims=True)
        e = jnp.exp(scores - m)
        inv = pl.reciprocal(jnp.sum(e, axis=-1, keepdims=True), approx=True)
        a = e * inv                                                        # (S, S)
        a_ref[0, h] = a

        # Fused trailing matmul: A @ [V | Q]  -> (S, 2*d_k) in one MXU push.
        vq = jnp.concatenate([v, q], axis=-1)
        hvq = jnp.dot(a, vq, preferred_element_type=jnp.float32)
        h1_heads.append(hvq[:, :d_k])                # A @ V
        h_heads.append(hvq[:, d_k:])                 # A @ Q_scaled

    # Merge heads in-register -> lane-dense (S, D) slabs, then fused output
    # projections (epilogue), written as (1, S, D) lane-dense outputs.
    h_cat = jnp.concatenate(h_heads, axis=-1)        # (S, D)
    h1_cat = jnp.concatenate(h1_heads, axis=-1)      # (S, D)
    h_ref[0] = (jnp.dot(h_cat, wht_ref[...], preferred_element_type=jnp.float32)
                + whb_ref[...])
    h1_ref[0] = (jnp.dot(h1_cat, wh1t_ref[...], preferred_element_type=jnp.float32)
                 + wh1b_ref[...])


def multi_head_attention(xq, xk, xv, attn_mask, params, num_heads):
    """Pallas implementation of MultiHeadAttention.forward.

    Returns (H, H1, A) matching the PyTorch module.
    """
    wq, wk, wv, wh_w, wh_b, wh1_w, wh1_b = params
    B, S, D = xq.shape
    d_k = D // num_heads

    # Host-side layout plumbing: pre-transpose weights, fold 1/sqrt(d_k) into
    # W_q (the reference scales Q itself, so scores AND H=A@Q see the scale).
    wq_t = (wq.T / np.sqrt(d_k)).astype(jnp.float32)
    wk_t = wk.T.astype(jnp.float32)
    wv_t = wv.T.astype(jnp.float32)
    wh_t = wh_w.T.astype(jnp.float32)
    wh1_t = wh1_w.T.astype(jnp.float32)
    wh_b2 = wh_b.reshape(1, D).astype(jnp.float32)
    wh1_b2 = wh1_b.reshape(1, D).astype(jnp.float32)

    kernel = functools.partial(_mha_kernel, num_heads=num_heads, d_k=d_k)

    weight_spec = pl.BlockSpec((D, D), lambda b: (0, 0))
    bias_spec = pl.BlockSpec((1, D), lambda b: (0, 0))

    A, H, H1 = pl.pallas_call(
        kernel,
        grid=(B,),
        in_specs=[
            pl.BlockSpec((1, S, D), lambda b: (b, 0, 0)),   # X_q
            pl.BlockSpec((1, S, D), lambda b: (b, 0, 0)),   # X_k
            pl.BlockSpec((1, S, D), lambda b: (b, 0, 0)),   # X_v
            weight_spec,                                    # W_q^T (pre-scaled)
            weight_spec,                                    # W_k^T
            weight_spec,                                    # W_v^T
            pl.BlockSpec((S, S), lambda b: (0, 0)),         # attn_mask
            weight_spec,                                    # W_h^T
            bias_spec,                                      # W_h bias
            weight_spec,                                    # W_h1^T
            bias_spec,                                      # W_h1 bias
        ],
        out_specs=[
            pl.BlockSpec((1, num_heads, S, S), lambda b: (b, 0, 0, 0)),  # A
            pl.BlockSpec((1, S, D), lambda b: (b, 0, 0)),                # H
            pl.BlockSpec((1, S, D), lambda b: (b, 0, 0)),                # H1
        ],
        out_shape=[
            jax.ShapeDtypeStruct((B, num_heads, S, S), jnp.float32),
            jax.ShapeDtypeStruct((B, S, D), jnp.float32),
            jax.ShapeDtypeStruct((B, S, D), jnp.float32),
        ],
        compiler_params=pltpu.CompilerParams(
            dimension_semantics=("parallel",)),
    )(xq, xk, xv, wq_t, wk_t, wv_t, attn_mask, wh_t, wh_b2, wh1_t, wh1_b2)

    return H, H1, A


def _reference(xq, xk, xv, attn_mask, params, num_heads):
    """Pure-JAX reference mirroring the PyTorch module."""
    wq, wk, wv, wh_w, wh_b, wh1_w, wh1_b = params
    B, S, D = xq.shape
    d_k = D // num_heads

    def split(x):
        return x.reshape(B, S, num_heads, d_k).transpose(0, 2, 1, 3)

    Q = split(xq @ wq.T) / np.sqrt(d_k)
    K = split(xk @ wk.T)
    V = split(xv @ wv.T)
    scores = jnp.einsum('bhqd,bhkd->bhqk', Q, K) + attn_mask[None, None]
    A = jax.nn.softmax(scores, axis=-1)
    H1 = jnp.einsum('bhqk,bhkd->bhqd', A, V)
    H = jnp.einsum('bhqk,bhkd->bhqd', A, Q)

    def merge(x):
        return x.transpose(0, 2, 1, 3).reshape(B, S, D)

    return merge(H) @ wh_w.T + wh_b, merge(H1) @ wh1_w.T + wh1_b, A


if __name__ == "__main__":
    B, S, D, NUM_HEADS = 2, 8, 32, 4

    key = jax.random.PRNGKey(0)
    keys = jax.random.split(key, 12)
    xq = jax.random.normal(keys[0], (B, S, D), jnp.float32)
    xk = jax.random.normal(keys[1], (B, S, D), jnp.float32)
    xv = jax.random.normal(keys[2], (B, S, D), jnp.float32)

    # causal additive mask (S, S), broadcast over batch & heads inside kernel
    attn_mask = jnp.where(
        jnp.tril(jnp.ones((S, S), jnp.bool_)), 0.0, -1e9).astype(jnp.float32)

    # deterministic synthetic parameters (shapes follow nn.Linear: (out, in))
    params = (
        0.1 * jax.random.normal(keys[3], (D, D), jnp.float32),   # W_q (no bias)
        0.1 * jax.random.normal(keys[4], (D, D), jnp.float32),   # W_k (no bias)
        0.1 * jax.random.normal(keys[5], (D, D), jnp.float32),   # W_v (no bias)
        0.1 * jax.random.normal(keys[6], (D, D), jnp.float32),   # W_h weight
        0.1 * jax.random.normal(keys[7], (D,), jnp.float32),     # W_h bias
        0.1 * jax.random.normal(keys[8], (D, D), jnp.float32),   # W_h1 weight
        0.1 * jax.random.normal(keys[9], (D,), jnp.float32),     # W_h1 bias
    )

    H, H1, A = multi_head_attention(xq, xk, xv, attn_mask, params, NUM_HEADS)
    jax.block_until_ready((H, H1, A))

    H_ref, H1_ref, A_ref = _reference(xq, xk, xv, attn_mask, params, NUM_HEADS)
    # tolerances account for the approx (EUP) reciprocal in the softmax
    np.testing.assert_allclose(np.asarray(A), np.asarray(A_ref), atol=5e-3, rtol=5e-3)
    np.testing.assert_allclose(np.asarray(H), np.asarray(H_ref), atol=5e-3, rtol=5e-3)
    np.testing.assert_allclose(np.asarray(H1), np.asarray(H1_ref), atol=5e-3, rtol=5e-3)

    print("KERNEL_OK")
</pallas_src>

<mosaic_0001>
module attributes {stable_mosaic.version = 11 : i64} {
  func.func @_mha_kernel(%arg0: i32, %arg1: memref<1x8x32xf32, #tpu.memory_space<vmem>>, %arg2: memref<1x8x32xf32, #tpu.memory_space<vmem>>, %arg3: memref<1x8x32xf32, #tpu.memory_space<vmem>>, %arg4: memref<32x32xf32, #tpu.memory_space<vmem>>, %arg5: memref<32x32xf32, #tpu.memory_space<vmem>>, %arg6: memref<32x32xf32, #tpu.memory_space<vmem>>, %arg7: memref<8x8xf32, #tpu.memory_space<vmem>>, %arg8: memref<32x32xf32, #tpu.memory_space<vmem>>, %arg9: memref<1x32xf32, #tpu.memory_space<vmem>>, %arg10: memref<32x32xf32, #tpu.memory_space<vmem>>, %arg11: memref<1x32xf32, #tpu.memory_space<vmem>>, %arg12: memref<1x4x8x8xf32, #tpu.memory_space<vmem>>, %arg13: memref<1x8x32xf32, #tpu.memory_space<vmem>>, %arg14: memref<1x8x32xf32, #tpu.memory_space<vmem>>) attributes {dimension_semantics = [#tpu.dimension_semantics<parallel>], iteration_bounds = array<i64: 2>, scalar_prefetch = 0 : i64, scratch_operands = 0 : i64, tpu.core_type = #tpu.core_type<tc>, window_params = [{transform_indices = @transform_0, window_bounds = array<i64: 1, 8, 32>}, {transform_indices = @transform_1, window_bounds = array<i64: 1, 8, 32>}, {transform_indices = @transform_2, window_bounds = array<i64: 1, 8, 32>}, {pipeline_mode = #tpu.pipeline_mode<synchronous>, transform_indices = @transform_3, window_bounds = array<i64: 32, 32>}, {pipeline_mode = #tpu.pipeline_mode<synchronous>, transform_indices = @transform_4, window_bounds = array<i64: 32, 32>}, {pipeline_mode = #tpu.pipeline_mode<synchronous>, transform_indices = @transform_5, window_bounds = array<i64: 32, 32>}, {pipeline_mode = #tpu.pipeline_mode<synchronous>, transform_indices = @transform_6, window_bounds = array<i64: 8, 8>}, {pipeline_mode = #tpu.pipeline_mode<synchronous>, transform_indices = @transform_7, window_bounds = array<i64: 32, 32>}, {pipeline_mode = #tpu.pipeline_mode<synchronous>, transform_indices = @transform_8, window_bounds = array<i64: 1, 32>}, {pipeline_mode = #tpu.pipeline_mode<synchronous>, transform_indices = @transform_9, window_bounds = array<i64: 32, 32>}, {pipeline_mode = #tpu.pipeline_mode<synchronous>, transform_indices = @transform_10, window_bounds = array<i64: 1, 32>}, {transform_indices = @transform_11, window_bounds = array<i64: 1, 4, 8, 8>}, {transform_indices = @transform_12, window_bounds = array<i64: 1, 8, 32>}, {transform_indices = @transform_13, window_bounds = array<i64: 1, 8, 32>}]} {
    %c0 = arith.constant 0 : index
    %c0_0 = arith.constant 0 : index
    %c0_1 = arith.constant 0 : index
    %0 = vector.load %arg1[%c0, %c0_0, %c0_1] : memref<1x8x32xf32, #tpu.memory_space<vmem>>, vector<1x8x32xf32>
    %1 = vector.shape_cast %0 : vector<1x8x32xf32> to vector<8x32xf32>
    %c0_2 = arith.constant 0 : index
    %c0_3 = arith.constant 0 : index
    %c0_4 = arith.constant 0 : index
    %2 = vector.load %arg2[%c0_2, %c0_3, %c0_4] : memref<1x8x32xf32, #tpu.memory_space<vmem>>, vector<1x8x32xf32>
    %3 = vector.shape_cast %2 : vector<1x8x32xf32> to vector<8x32xf32>
    %c0_5 = arith.constant 0 : index
    %c0_6 = arith.constant 0 : index
    %c0_7 = arith.constant 0 : index
    %4 = vector.load %arg3[%c0_5, %c0_6, %c0_7] : memref<1x8x32xf32, #tpu.memory_space<vmem>>, vector<1x8x32xf32>
    %5 = vector.shape_cast %4 : vector<1x8x32xf32> to vector<8x32xf32>
    %c0_8 = arith.constant 0 : index
    %c0_9 = arith.constant 0 : index
    %6 = vector.load %arg4[%c0_8, %c0_9] : memref<32x32xf32, #tpu.memory_space<vmem>>, vector<32x32xf32>
    %cst = arith.constant dense<0.000000e+00> : vector<8x32xf32>
    %7 = tpu.matmul %1, %6, %cst {dimension_numbers = #tpu.dot_dimension_numbers<[1], [0], [0], [1], [0, 0, 1, 1], [], []>} : vector<8x32xf32>, vector<32x32xf32>, vector<8x32xf32> -> vector<8x32xf32>
    %c0_10 = arith.constant 0 : index
    %c0_11 = arith.constant 0 : index
    %8 = vector.load %arg5[%c0_10, %c0_11] : memref<32x32xf32, #tpu.memory_space<vmem>>, vector<32x32xf32>
    %cst_12 = arith.constant dense<0.000000e+00> : vector<8x32xf32>
    %9 = tpu.matmul %3, %8, %cst_12 {dimension_numbers = #tpu.dot_dimension_numbers<[1], [0], [0], [1], [0, 0, 1, 1], [], []>} : vector<8x32xf32>, vector<32x32xf32>, vector<8x32xf32> -> vector<8x32xf32>
    %c0_13 = arith.constant 0 : index
    %c0_14 = arith.constant 0 : index
    %10 = vector.load %arg6[%c0_13, %c0_14] : memref<32x32xf32, #tpu.memory_space<vmem>>, vector<32x32xf32>
    %cst_15 = arith.constant dense<0.000000e+00> : vector<8x32xf32>
    %11 = tpu.matmul %5, %10, %cst_15 {dimension_numbers = #tpu.dot_dimension_numbers<[1], [0], [0], [1], [0, 0, 1, 1], [], []>} : vector<8x32xf32>, vector<32x32xf32>, vector<8x32xf32> -> vector<8x32xf32>
    %c0_16 = arith.constant 0 : index
    %c0_17 = arith.constant 0 : index
    %12 = vector.load %arg7[%c0_16, %c0_17] : memref<8x8xf32, #tpu.memory_space<vmem>>, vector<8x8xf32>
    %13 = vector.extract_strided_slice %7 {offsets = [0, 0], sizes = [8, 8], strides = [1, 1]} : vector<8x32xf32> to vector<8x8xf32>
    %14 = vector.extract_strided_slice %9 {offsets = [0, 0], sizes = [8, 8], strides = [1, 1]} : vector<8x32xf32> to vector<8x8xf32>
    %15 = vector.extract_strided_slice %11 {offsets = [0, 0], sizes = [8, 8], strides = [1, 1]} : vector<8x32xf32> to vector<8x8xf32>
    %cst_18 = arith.constant dense<0.000000e+00> : vector<8x8xf32>
    %16 = tpu.matmul %13, %14, %cst_18 {dimension_numbers = #tpu.dot_dimension_numbers<[1], [1], [0], [0], [0, 0, 1, 0], [], []>} : vector<8x8xf32>, vector<8x8xf32>, vector<8x8xf32> -> vector<8x8xf32>
    %17 = arith.addf %16, %12 : vector<8x8xf32>
    %cst_19 = arith.constant dense<0xFF800000> : vector<8xf32>
    %18 = vector.multi_reduction <maximumf>, %17, %cst_19 [1] : vector<8x8xf32> to vector<8xf32>
    %19 = vector.shape_cast %18 : vector<8xf32> to vector<8x1xf32>
    %20 = vector.broadcast %19 : vector<8x1xf32> to vector<8x8xf32>
    %21 = arith.subf %17, %20 : vector<8x8xf32>
    %22 = math.exp %21 : vector<8x8xf32>
    %cst_20 = arith.constant dense<0.000000e+00> : vector<8xf32>
    %23 = vector.multi_reduction <add>, %22, %cst_20 [1] : vector<8x8xf32> to vector<8xf32>
    %24 = vector.shape_cast %23 : vector<8xf32> to vector<8x1xf32>
    %25 = tpu.reciprocal %24 {approx = true} : vector<8x1xf32> -> vector<8x1xf32>
    %26 = vector.broadcast %25 : vector<8x1xf32> to vector<8x8xf32>
    %27 = arith.mulf %22, %26 : vector<8x8xf32>
    %c0_21 = arith.constant 0 : index
    %c0_22 = arith.constant 0 : index
    %c0_23 = arith.constant 0 : index
    %c0_24 = arith.constant 0 : index
    %28 = vector.load %arg12[%c0_21, %c0_22, %c0_23, %c0_24] : memref<1x4x8x8xf32, #tpu.memory_space<vmem>>, vector<1x1x8x8xf32>
    %29 = vector.shape_cast %28 : vector<1x1x8x8xf32> to vector<8x8xf32>
    %30 = vector.shape_cast %27 : vector<8x8xf32> to vector<1x1x8x8xf32>
    tpu.vector_store %arg12[%c0_21, %c0_22, %c0_23, %c0_24], %30 {strides = array<i32>} : memref<1x4x8x8xf32, #tpu.memory_space<vmem>>, vector<1x1x8x8xf32>,
    %31 = tpu.concatenate %15, %13 in 1 : vector<8x8xf32>, vector<8x8xf32> -> vector<8x16xf32>
    %cst_25 = arith.constant dense<0.000000e+00> : vector<8x16xf32>
    %32 = tpu.matmul %27, %31, %cst_25 {dimension_numbers = #tpu.dot_dimension_numbers<[1], [0], [0], [1], [0, 0, 1, 1], [], []>} : vector<8x8xf32>, vector<8x16xf32>, vector<8x16xf32> -> vector<8x16xf32>
    %33 = vector.extract_strided_slice %32 {offsets = [0, 0], sizes = [8, 8], strides = [1, 1]} : vector<8x16xf32> to vector<8x8xf32>
    %34 = vector.extract_strided_slice %32 {offsets = [0, 8], sizes = [8, 8], strides = [1, 1]} : vector<8x16xf32> to vector<8x8xf32>
    %35 = vector.extract_strided_slice %7 {offsets = [0, 8], sizes = [8, 8], strides = [1, 1]} : vector<8x32xf32> to vector<8x8xf32>
    %36 = vector.extract_strided_slice %9 {offsets = [0, 8], sizes = [8, 8], strides = [1, 1]} : vector<8x32xf32> to vector<8x8xf32>
    %37 = vector.extract_strided_slice %11 {offsets = [0, 8], sizes = [8, 8], strides = [1, 1]} : vector<8x32xf32> to vector<8x8xf32>
    %cst_26 = arith.constant dense<0.000000e+00> : vector<8x8xf32>
    %38 = tpu.matmul %35, %36, %cst_26 {dimension_numbers = #tpu.dot_dimension_numbers<[1], [1], [0], [0], [0, 0, 1, 0], [], []>} : vector<8x8xf32>, vector<8x8xf32>, vector<8x8xf32> -> vector<8x8xf32>
    %39 = arith.addf %38, %12 : vector<8x8xf32>
    %cst_27 = arith.constant dense<0xFF800000> : vector<8xf32>
    %40 = vector.multi_reduction <maximumf>, %39, %cst_27 [1] : vector<8x8xf32> to vector<8xf32>
    %41 = vector.shape_cast %40 : vector<8xf32> to vector<8x1xf32>
    %42 = vector.broadcast %41 : vector<8x1xf32> to vector<8x8xf32>
    %43 = arith.subf %39, %42 : vector<8x8xf32>
    %44 = math.exp %43 : vector<8x8xf32>
    %cst_28 = arith.constant dense<0.000000e+00> : vector<8xf32>
    %45 = vector.multi_reduction <add>, %44, %cst_28 [1] : vector<8x8xf32> to vector<8xf32>
    %46 = vector.shape_cast %45 : vector<8xf32> to vector<8x1xf32>
    %47 = tpu.reciprocal %46 {approx = true} : vector<8x1xf32> -> vector<8x1xf32>
    %48 = vector.broadcast %47 : vector<8x1xf32> to vector<8x8xf32>
    %49 = arith.mulf %44, %48 : vector<8x8xf32>
    %c0_29 = arith.constant 0 : index
    %c1 = arith.constant 1 : index
    %c0_30 = arith.constant 0 : index
    %c0_31 = arith.constant 0 : index
    %50 = vector.load %arg12[%c0_29, %c1, %c0_30, %c0_31] : memref<1x4x8x8xf32, #tpu.memory_space<vmem>>, vector<1x1x8x8xf32>
    %51 = vector.shape_cast %50 : vector<1x1x8x8xf32> to vector<8x8xf32>
    %52 = vector.shape_cast %49 : vector<8x8xf32> to vector<1x1x8x8xf32>
    tpu.vector_store %arg12[%c0_29, %c1, %c0_30, %c0_31], %52 {strides = array<i32>} : memref<1x4x8x8xf32, #tpu.memory_space<vmem>>, vector<1x1x8x8xf32>,
    %53 = tpu.concatenate %37, %35 in 1 : vector<8x8xf32>, vector<8x8xf32> -> vector<8x16xf32>
    %cst_32 = arith.constant dense<0.000000e+00> : vector<8x16xf32>
    %54 = tpu.matmul %49, %53, %cst_32 {dimension_numbers = #tpu.dot_dimension_numbers<[1], [0], [0], [1], [0, 0, 1, 1], [], []>} : vector<8x8xf32>, vector<8x16xf32>, vector<8x16xf32> -> vector<8x16xf32>
    %55 = vector.extract_strided_slice %54 {offsets = [0, 0], sizes = [8, 8], strides = [1, 1]} : vector<8x16xf32> to vector<8x8xf32>
    %56 = vector.extract_strided_slice %54 {offsets = [0, 8], sizes = [8, 8], strides = [1, 1]} : vector<8x16xf32> to vector<8x8xf32>
    %57 = vector.extract_strided_slice %7 {offsets = [0, 16], sizes = [8, 8], strides = [1, 1]} : vector<8x32xf32> to vector<8x8xf32>
    %58 = vector.extract_strided_slice %9 {offsets = [0, 16], sizes = [8, 8], strides = [1, 1]} : vector<8x32xf32> to vector<8x8xf32>
    %59 = vector.extract_strided_slice %11 {offsets = [0, 16], sizes = [8, 8], strides = [1, 1]} : vector<8x32xf32> to vector<8x8xf32>
    %cst_33 = arith.constant dense<0.000000e+00> : vector<8x8xf32>
    %60 = tpu.matmul %57, %58, %cst_33 {dimension_numbers = #tpu.dot_dimension_numbers<[1], [1], [0], [0], [0, 0, 1, 0], [], []>} : vector<8x8xf32>, vector<8x8xf32>, vector<8x8xf32> -> vector<8x8xf32>
    %61 = arith.addf %60, %12 : vector<8x8xf32>
    %cst_34 = arith.constant dense<0xFF800000> : vector<8xf32>
    %62 = vector.multi_reduction <maximumf>, %61, %cst_34 [1] : vector<8x8xf32> to vector<8xf32>
    %63 = vector.shape_cast %62 : vector<8xf32> to vector<8x1xf32>
    %64 = vector.broadcast %63 : vector<8x1xf32> to vector<8x8xf32>
    %65 = arith.subf %61, %64 : vector<8x8xf32>
    %66 = math.exp %65 : vector<8x8xf32>
    %cst_35 = arith.constant dense<0.000000e+00> : vector<8xf32>
    %67 = vector.multi_reduction <add>, %66, %cst_35 [1] : vector<8x8xf32> to vector<8xf32>
    %68 = vector.shape_cast %67 : vector<8xf32> to vector<8x1xf32>
    %69 = tpu.reciprocal %68 {approx = true} : vector<8x1xf32> -> vector<8x1xf32>
    %70 = vector.broadcast %69 : vector<8x1xf32> to vector<8x8xf32>
    %71 = arith.mulf %66, %70 : vector<8x8xf32>
    %c0_36 = arith.constant 0 : index
    %c2 = arith.constant 2 : index
    %c0_37 = arith.constant 0 : index
    %c0_38 = arith.constant 0 : index
    %72 = vector.load %arg12[%c0_36, %c2, %c0_37, %c0_38] : memref<1x4x8x8xf32, #tpu.memory_space<vmem>>, vector<1x1x8x8xf32>
    %73 = vector.shape_cast %72 : vector<1x1x8x8xf32> to vector<8x8xf32>
    %74 = vector.shape_cast %71 : vector<8x8xf32> to vector<1x1x8x8xf32>
    tpu.vector_store %arg12[%c0_36, %c2, %c0_37, %c0_38], %74 {strides = array<i32>} : memref<1x4x8x8xf32, #tpu.memory_space<vmem>>, vector<1x1x8x8xf32>,
    %75 = tpu.concatenate %59, %57 in 1 : vector<8x8xf32>, vector<8x8xf32> -> vector<8x16xf32>
    %cst_39 = arith.constant dense<0.000000e+00> : vector<8x16xf32>
    %76 = tpu.matmul %71, %75, %cst_39 {dimension_numbers = #tpu.dot_dimension_numbers<[1], [0], [0], [1], [0, 0, 1, 1], [], []>} : vector<8x8xf32>, vector<8x16xf32>, vector<8x16xf32> -> vector<8x16xf32>
    %77 = vector.extract_strided_slice %76 {offsets = [0, 0], sizes = [8, 8], strides = [1, 1]} : vector<8x16xf32> to vector<8x8xf32>
    %78 = vector.extract_strided_slice %76 {offsets = [0, 8], sizes = [8, 8], strides = [1, 1]} : vector<8x16xf32> to vector<8x8xf32>
    %79 = vector.extract_strided_slice %7 {offsets = [0, 24], sizes = [8, 8], strides = [1, 1]} : vector<8x32xf32> to vector<8x8xf32>
    %80 = vector.extract_strided_slice %9 {offsets = [0, 24], sizes = [8, 8], strides = [1, 1]} : vector<8x32xf32> to vector<8x8xf32>
    %81 = vector.extract_strided_slice %11 {offsets = [0, 24], sizes = [8, 8], strides = [1, 1]} : vector<8x32xf32> to vector<8x8xf32>
    %cst_40 = arith.constant dense<0.000000e+00> : vector<8x8xf32>
    %82 = tpu.matmul %79, %80, %cst_40 {dimension_numbers = #tpu.dot_dimension_numbers<[1], [1], [0], [0], [0, 0, 1, 0], [], []>} : vector<8x8xf32>, vector<8x8xf32>, vector<8x8xf32> -> vector<8x8xf32>
    %83 = arith.addf %82, %12 : vector<8x8xf32>
    %cst_41 = arith.constant dense<0xFF800000> : vector<8xf32>
    %84 = vector.multi_reduction <maximumf>, %83, %cst_41 [1] : vector<8x8xf32> to vector<8xf32>
    %85 = vector.shape_cast %84 : vector<8xf32> to vector<8x1xf32>
    %86 = vector.broadcast %85 : vector<8x1xf32> to vector<8x8xf32>
    %87 = arith.subf %83, %86 : vector<8x8xf32>
    %88 = math.exp %87 : vector<8x8xf32>
    %cst_42 = arith.constant dense<0.000000e+00> : vector<8xf32>
    %89 = vector.multi_reduction <add>, %88, %cst_42 [1] : vector<8x8xf32> to vector<8xf32>
    %90 = vector.shape_cast %89 : vector<8xf32> to vector<8x1xf32>
    %91 = tpu.reciprocal %90 {approx = true} : vector<8x1xf32> -> vector<8x1xf32>
    %92 = vector.broadcast %91 : vector<8x1xf32> to vector<8x8xf32>
    %93 = arith.mulf %88, %92 : vector<8x8xf32>
    %c0_43 = arith.constant 0 : index
    %c3 = arith.constant 3 : index
    %c0_44 = arith.constant 0 : index
    %c0_45 = arith.constant 0 : index
    %94 = vector.load %arg12[%c0_43, %c3, %c0_44, %c0_45] : memref<1x4x8x8xf32, #tpu.memory_space<vmem>>, vector<1x1x8x8xf32>
    %95 = vector.shape_cast %94 : vector<1x1x8x8xf32> to vector<8x8xf32>
    %96 = vector.shape_cast %93 : vector<8x8xf32> to vector<1x1x8x8xf32>
    tpu.vector_store %arg12[%c0_43, %c3, %c0_44, %c0_45], %96 {strides = array<i32>} : memref<1x4x8x8xf32, #tpu.memory_space<vmem>>, vector<1x1x8x8xf32>,
    %97 = tpu.concatenate %81, %79 in 1 : vector<8x8xf32>, vector<8x8xf32> -> vector<8x16xf32>
    %cst_46 = arith.constant dense<0.000000e+00> : vector<8x16xf32>
    %98 = tpu.matmul %93, %97, %cst_46 {dimension_numbers = #tpu.dot_dimension_numbers<[1], [0], [0], [1], [0, 0, 1, 1], [], []>} : vector<8x8xf32>, vector<8x16xf32>, vector<8x16xf32> -> vector<8x16xf32>
    %99 = vector.extract_strided_slice %98 {offsets = [0, 0], sizes = [8, 8], strides = [1, 1]} : vector<8x16xf32> to vector<8x8xf32>
    %100 = vector.extract_strided_slice %98 {offsets = [0, 8], sizes = [8, 8], strides = [1, 1]} : vector<8x16xf32> to vector<8x8xf32>
    %101 = tpu.concatenate %34, %56, %78, %100 in 1 : vector<8x8xf32>, vector<8x8xf32>, vector<8x8xf32>, vector<8x8xf32> -> vector<8x32xf32>
    %102 = tpu.concatenate %33, %55, %77, %99 in 1 : vector<8x8xf32>, vector<8x8xf32>, vector<8x8xf32>, vector<8x8xf32> -> vector<8x32xf32>
    %c0_47 = arith.constant 0 : index
    %c0_48 = arith.constant 0 : index
    %103 = vector.load %arg8[%c0_47, %c0_48] : memref<32x32xf32, #tpu.memory_space<vmem>>, vector<32x32xf32>
    %cst_49 = arith.constant dense<0.000000e+00> : vector<8x32xf32>
    %104 = tpu.matmul %101, %103, %cst_49 {dimension_numbers = #tpu.dot_dimension_numbers<[1], [0], [0], [1], [0, 0, 1, 1], [], []>} : vector<8x32xf32>, vector<32x32xf32>, vector<8x32xf32> -> vector<8x32xf32>
    %c0_50 = arith.constant 0 : index
    %c0_51 = arith.constant 0 : index
    %105 = vector.load %arg9[%c0_50, %c0_51] : memref<1x32xf32, #tpu.memory_space<vmem>>, vector<1x32xf32>
    %106 = vector.broadcast %105 : vector<1x32xf32> to vector<8x32xf32>
    %107 = arith.addf %104, %106 : vector<8x32xf32>
    %c0_52 = arith.constant 0 : index
    %c0_53 = arith.constant 0 : index
    %c0_54 = arith.constant 0 : index
    %108 = vector.load %arg13[%c0_52, %c0_53, %c0_54] : memref<1x8x32xf32, #tpu.memory_space<vmem>>, vector<1x8x32xf32>
    %109 = vector.shape_cast %108 : vector<1x8x32xf32> to vector<8x32xf32>
    %110 = vector.shape_cast %107 : vector<8x32xf32> to vector<1x8x32xf32>
    tpu.vector_store %arg13[%c0_52, %c0_53, %c0_54], %110 {strides = array<i32>} : memref<1x8x32xf32, #tpu.memory_space<vmem>>, vector<1x8x32xf32>,
    %c0_55 = arith.constant 0 : index
    %c0_56 = arith.constant 0 : index
    %111 = vector.load %arg10[%c0_55, %c0_56] : memref<32x32xf32, #tpu.memory_space<vmem>>, vector<32x32xf32>
    %cst_57 = arith.constant dense<0.000000e+00> : vector<8x32xf32>
    %112 = tpu.matmul %102, %111, %cst_57 {dimension_numbers = #tpu.dot_dimension_numbers<[1], [0], [0], [1], [0, 0, 1, 1], [], []>} : vector<8x32xf32>, vector<32x32xf32>, vector<8x32xf32> -> vector<8x32xf32>
    %c0_58 = arith.constant 0 : index
    %c0_59 = arith.constant 0 : index
    %113 = vector.load %arg11[%c0_58, %c0_59] : memref<1x32xf32, #tpu.memory_space<vmem>>, vector<1x32xf32>
    %114 = vector.broadcast %113 : vector<1x32xf32> to vector<8x32xf32>
    %115 = arith.addf %112, %114 : vector<8x32xf32>
    %c0_60 = arith.constant 0 : index
    %c0_61 = arith.constant 0 : index
    %c0_62 = arith.constant 0 : index
    %116 = vector.load %arg14[%c0_60, %c0_61, %c0_62] : memref<1x8x32xf32, #tpu.memory_space<vmem>>, vector<1x8x32xf32>
    %117 = vector.shape_cast %116 : vector<1x8x32xf32> to vector<8x32xf32>
    %118 = vector.shape_cast %115 : vector<8x32xf32> to vector<1x8x32xf32>
    tpu.vector_store %arg14[%c0_60, %c0_61, %c0_62], %118 {strides = array<i32>} : memref<1x8x32xf32, #tpu.memory_space<vmem>>, vector<1x8x32xf32>,
    return
  }
  func.func @transform_0(%arg0: i32) -> (i32, i32, i32) {
    %c0_i32 = arith.constant 0 : i32
    %c0_i32_0 = arith.constant 0 : i32
    %c0_i32_1 = arith.constant 0 : i32
    return %arg0, %c0_i32, %c0_i32_0 : i32, i32, i32
  }
  func.func @transform_1(%arg0: i32) -> (i32, i32, i32) {
    %c0_i32 = arith.constant 0 : i32
    %c0_i32_0 = arith.constant 0 : i32
    %c0_i32_1 = arith.constant 0 : i32
    return %arg0, %c0_i32, %c0_i32_0 : i32, i32, i32
  }
  func.func @transform_2(%arg0: i32) -> (i32, i32, i32) {
    %c0_i32 = arith.constant 0 : i32
    %c0_i32_0 = arith.constant 0 : i32
    %c0_i32_1 = arith.constant 0 : i32
    return %arg0, %c0_i32, %c0_i32_0 : i32, i32, i32
  }
  func.func @transform_3(%arg0: i32) -> (i32, i32) {
    %c0_i32 = arith.constant 0 : i32
    %c0_i32_0 = arith.constant 0 : i32
    %c0_i32_1 = arith.constant 0 : i32
    return %c0_i32, %c0_i32_0 : i32, i32
  }
  func.func @transform_4(%arg0: i32) -> (i32, i32) {
    %c0_i32 = arith.constant 0 : i32
    %c0_i32_0 = arith.constant 0 : i32
    %c0_i32_1 = arith.constant 0 : i32
    return %c0_i32, %c0_i32_0 : i32, i32
  }
  func.func @transform_5(%arg0: i32) -> (i32, i32) {
    %c0_i32 = arith.constant 0 : i32
    %c0_i32_0 = arith.constant 0 : i32
    %c0_i32_1 = arith.constant 0 : i32
    return %c0_i32, %c0_i32_0 : i32, i32
  }
  func.func @transform_6(%arg0: i32) -> (i32, i32) {
    %c0_i32 = arith.constant 0 : i32
    %c0_i32_0 = arith.constant 0 : i32
    %c0_i32_1 = arith.constant 0 : i32
    return %c0_i32, %c0_i32_0 : i32, i32
  }
  func.func @transform_7(%arg0: i32) -> (i32, i32) {
    %c0_i32 = arith.constant 0 : i32
    %c0_i32_0 = arith.constant 0 : i32
    %c0_i32_1 = arith.constant 0 : i32
    return %c0_i32, %c0_i32_0 : i32, i32
  }
  func.func @transform_8(%arg0: i32) -> (i32, i32) {
    %c0_i32 = arith.constant 0 : i32
    %c0_i32_0 = arith.constant 0 : i32
    %c0_i32_1 = arith.constant 0 : i32
    return %c0_i32, %c0_i32_0 : i32, i32
  }
  func.func @transform_9(%arg0: i32) -> (i32, i32) {
    %c0_i32 = arith.constant 0 : i32
    %c0_i32_0 = arith.constant 0 : i32
    %c0_i32_1 = arith.constant 0 : i32
    return %c0_i32, %c0_i32_0 : i32, i32
  }
  func.func @transform_10(%arg0: i32) -> (i32, i32) {
    %c0_i32 = arith.constant 0 : i32
    %c0_i32_0 = arith.constant 0 : i32
    %c0_i32_1 = arith.constant 0 : i32
    return %c0_i32, %c0_i32_0 : i32, i32
  }
  func.func @transform_11(%arg0: i32) -> (i32, i32, i32, i32) {
    %c0_i32 = arith.constant 0 : i32
    %c0_i32_0 = arith.constant 0 : i32
    %c0_i32_1 = arith.constant 0 : i32
    %c0_i32_2 = arith.constant 0 : i32
    return %arg0, %c0_i32, %c0_i32_0, %c0_i32_1 : i32, i32, i32, i32
  }
  func.func @transform_12(%arg0: i32) -> (i32, i32, i32) {
    %c0_i32 = arith.constant 0 : i32
    %c0_i32_0 = arith.constant 0 : i32
    %c0_i32_1 = arith.constant 0 : i32
    return %arg0, %c0_i32, %c0_i32_0 : i32, i32, i32
  }
  func.func @transform_13(%arg0: i32) -> (i32, i32, i32) {
    %c0_i32 = arith.constant 0 : i32
    %c0_i32_0 = arith.constant 0 : i32
    %c0_i32_1 = arith.constant 0 : i32
    return %arg0, %c0_i32, %c0_i32_0 : i32, i32, i32
  }
}

</mosaic_0001>

<bundles_post_ra>
// kernel: tpu_custom_call.1
= control target key start
LH: loop header
LB: loop body
LE: loop exit
PB: predicated region body
PF: predicated region fallthrough
CT: control target
= control target key end

     0   :  { %s3442_s0 = inlined_call_operand.hbm [shape: f32[2,8,32], index: 0, kind: input, shape index: {}]   ;;  %s3443_s1 = inlined_call_operand.hbm [shape: f32[2,8,32], index: 1, kind: input, shape index: {}]   ;;  %s3444_s2 = inlined_call_operand.hbm [shape: f32[2,8,32], index: 2, kind: input, shape index: {}]   ;;  %s3445_s3 = inlined_call_operand.hbm [shape: f32[32,32], index: 3, kind: input, shape index: {}]   ;;  %s3446_s4 = inlined_call_operand.hbm [shape: f32[32,32], index: 4, kind: input, shape index: {}]   ;;  %s3447_s5 = inlined_call_operand.hbm [shape: f32[32,32], index: 5, kind: input, shape index: {}]   ;;  %s3448_s6 = inlined_call_operand.hbm [shape: f32[8,8], index: 6, kind: input, shape index: {}]   ;;  %s3449_s7 = inlined_call_operand.hbm [shape: f32[32,32], index: 7, kind: input, shape index: {}]   ;;  %s3450_s8 = inlined_call_operand.vmem [shape: f32[1,32], index: 8, kind: input, shape index: {}]   ;;  %s3451_s9 = inlined_call_operand.vmem [shape: f32[32,32], index: 9, kind: input, shape index: {}]   ;;  %s3452_s10 = inlined_call_operand.vmem [shape: f32[1,32], index: 10, kind: input, shape index: {}]   ;;  %s3453_s11 = inlined_call_operand.hbm [shape: f32[2,4,8,8], index: 11, kind: output, shape index: {0}]   ;;  %s3454_s12 = inlined_call_operand.hbm [shape: f32[2,8,32], index: 12, kind: output, shape index: {1}]   ;;  %s3455_s13 = inlined_call_operand.hbm [shape: f32[2,8,32], index: 13, kind: output, shape index: {2}]  }
   0x1   :  { %3488 = sst [smem:[#allocation34_spill]] %s3443_s1 }
   0x2   :  { %3489 = sst [smem:[#allocation35_spill]] %s3445_s3 }
   0x3   :  { %3490 = sst [smem:[#allocation36_spill]] %s3447_s5 }
   0x4   :  { %3491 = sst [smem:[#allocation37_spill]] %s3450_s8 }
   0x5   :  { %3492 = sst [smem:[#allocation38_spill]] %s3451_s9 }
   0x6   :  { %3493 = sst [smem:[#allocation39_spill]] %s3452_s10 }
   0x7   :  { %3494 = sst [smem:[#allocation40_spill]] %s3453_s11 }
   0x8   :  { %3495 = sst [smem:[#allocation41_spill]] %s3454_s12 }
   0x9   :  { %3496 = sst [smem:[#allocation42_spill]] %s3455_s13 }
   0xa   :  { %19 = vsyncpa [#allocation3], 0 }
   0xb   :  { %21 = vsyncpa [#allocation3 + $0x1], 0 }
   0xc   :  { %22 = vsyncpa [#allocation6], 0 }
   0xd   :  { %24 = vsyncpa [#allocation6 + $0x1], 0 }
   0xe   :  { %25 = vsyncpa [#allocation9], 0 }
   0xf   :  { %26 = vsyncpa [#allocation12], 0 }
  0x10   :  { %27 = vsyncpa [#allocation15], 0 }
  0x11   :  { %28 = vsyncpa [#allocation4], 0 }
  0x12   :  { %30 = vsyncpa [#allocation4 + $0x1], 0 }
  0x13   :  { %31 = vsyncpa [#allocation18], 0 }
  0x14   :  { %33 = vsyncpa [#allocation18 + $0x1], 0  ;;  %s2836_s25 = smov 0   ;;  %s2838_s26 = smov 0  }
  0x15   :  { %s2840_s27 = smov 0   ;;  %s2842_s28 = smov 0  }
  0x16 LB: > { %3497 = sst [smem:[#allocation27_spill]] %s2729_s25  ;;  %s2743_s29 = smov [#allocation8]   ;;  %s2741_s28 = sphi %s2842_s28, %s3546_s28   ;;  %s2737_s27 = sphi %s2840_s27, %s3550_s27   ;;  %s2733_s26 = sphi %s2838_s26, %s3549_s26   ;;  %s2729_s25 = sphi %s2836_s25, %s3548_s25  }
  0x17   : > { %3498 = sst [smem:[#allocation28_spill]] %s2741_s28  ;;  %s380_s30 = sshll.u32 %s2743_s29, 4  ;;  %s2862_s30 = int_to_ptr.vmem [resolvable:$true] %s380_s30 }
  0x18   : > { %s2857_s14 = sadd.s32 4294967295, %s2741_s28   ;;  %p2001_p0 = scmp.ge.s32.totalorder %s2741_s28, 1 }
  0x19   : > { %3499 = sst [smem:[#allocation29_spill]] %s2857_s14  ;;  %p3471_p1 = scmp.eq.s32.totalorder %s2857_s14, 0 }
  0x1a   : > { %p368_p2 = scmp.lt.s32.totalorder %s2741_s28, 3  ;;  %s2744_s16 = smov [#allocation11]  }
  0x1b   : > { %s406_s17 = sshll.u32 %s2744_s16, 4  ;;  %s3502_s3 = sld [smem:[#allocation35_spill]]  ;;  %s2877_s17 = int_to_ptr.vmem [resolvable:$true] %s406_s17 }
  0x1c   : > { %p2864_p3 = pnand %p2001_p0, %p368_p2 }
  0x1e   : > { %s3500_s15 = scalar_select %p2864_p3, 1, 0 }
  0x1f   : > { %p2256_p5 = pneg %p2864_p3 }
  0x21   : > { %p2873_p6 = pnand %p2256_p5, %p3471_p1  ;;  %s2369_s21 = scalar_lea.hbm %s3502_s3, 512 }
  0x22   : > { %p2370_p7 = scmp.ne.s32.totalorder %s3502_s3, %s2369_s21  ;;  %p2376_p11 = scmp.lt.u32.totalorder %s2369_s21, %s3502_s3 }
  0x23   : > { %s3501_s18 = scalar_select %p2873_p6, 1, 0 }
  0x24   : > { %p2887_p8 = pneg %p2873_p6 }
  0x26   : > { %s3503_s24 = scalar_select %p2887_p8, 1, 0 }
  0x27   : > { %p2372_p9 = pnand %p2887_p8, %p2370_p7 }
  0x29   : > { %p2373_p10 = pneg %p2372_p9 }
  0x2b   : > { %p2378_p12 = pnand %p2376_p11, %p2373_p10 }
  0x2d   : > { %2381 = shalt.err (!%p2378_p12)
}
  0x2e   : > { %s2382_s19 = scalar_lea.vmem %s2862_s30, 512  ;;  %p2390_p5 = scmp.lt.s32.totalorder %s2862_s30, %s2862_s30 }
  0x2f   : > { %p2383_p13 = scmp.ne.s32.totalorder %s2862_s30, %s2382_s19  ;;  %p2391_p4 = scmp.lt.s32.totalorder %s2382_s19, %s2382_s19 }
  0x31   : > { %p2385_p0 = pnand %p2383_p13, %p2887_p8  ;;  %p2392_p7 = por %p2391_p4, %p2390_p5 }
  0x33   : > { %p2386_p2 = pneg %p2385_p0 }
  0x35   : > { %p2393_p9 = pnand %p2392_p7, %p2386_p2 }
  0x37   : > { %2396 = shalt.err (!%p2393_p9)
}
  0x38   : > { %s3460_s20 = smov 128   ;;  %s3462_s21 = smov 8  }
  0x39   : > { %2259 = dma.hbm_to_vmem [thread:$0]  (!%p2873_p6), %s3502_s3, 512, %s2862_s30, [#allocation9], %s3460_s20, %s3460_s20, %s3462_s21  }
  0x3a   : > { %s3504_s5 = sld [smem:[#allocation36_spill]] }
  0x40   : > { %s2397_s19 = scalar_lea.hbm %s3504_s5, 512 }
  0x41   : > { %p2398_p4 = scmp.ne.s32.totalorder %s3504_s5, %s2397_s19  ;;  %p2404_p12 = scmp.lt.u32.totalorder %s2397_s19, %s3504_s5 }
  0x43   : > { %p2400_p10 = pnand %p2398_p4, %p2887_p8 }
  0x45   : > { %p2401_p11 = pneg %p2400_p10 }
  0x47   : > { %p2406_p13 = pnand %p2404_p12, %p2401_p11 }
  0x49   : > { %2409 = shalt.err (!%p2406_p13)
}
  0x4a   : > { %s2410_s30 = scalar_lea.vmem %s2877_s17, 512  ;;  %p2418_p7 = scmp.lt.s32.totalorder %s2877_s17, %s2877_s17 }
  0x4b   : > { %p2411_p0 = scmp.ne.s32.totalorder %s2877_s17, %s2410_s30  ;;  %p2419_p9 = scmp.lt.s32.totalorder %s2410_s30, %s2410_s30 }
  0x4d   : > { %p2413_p2 = pnand %p2411_p0, %p2887_p8  ;;  %p2420_p4 = por %p2419_p9, %p2418_p7 }
  0x4f   : > { %p2414_p5 = pneg %p2413_p2 }
  0x51   : > { %p2421_p10 = pnand %p2420_p4, %p2414_p5 }
  0x53   : > { %2424 = shalt.err (!%p2421_p10)
}
  0x54   : > { %2265 = dma.hbm_to_vmem [thread:$0]  (!%p2873_p6), %s3504_s5, 512, %s2877_s17, [#allocation12], %s3460_s20, %s3460_s20, %s3462_s21  }
  0x55   : > { %s3459_s12 = sadd.s32 4294967294, %s2741_s28   ;;  %s2939_s13 = sadd.s32 1, %s2741_s28  }
  0x56   : > { %3505 = sst [smem:[#allocation30_spill]] %s2939_s13  ;;  %s43_s22 = ssub.s32 %s2741_s28, %s2939_s13 }
  0x57   : > { %s46_s23 = sadd.s32 1, %s2737_s27  ;;  %p44_p11 = scmp.eq.s32.totalorder %s43_s22, 0 }
  0x58   : > { %p53_p12 = scmp.ne.s32.totalorder %s2737_s27, %s2733_s26  ;;  %p54_p13 = scmp.eq.s32.totalorder %s2741_s28, 0 }
  0x59   : > { %p59_p0 = scmp.ne.s32.totalorder %s2733_s26, %s2729_s25  ;;  %p303_p7 = scmp.eq.s32.totalorder %s2857_s14, 1 }
  0x5a   : > { %s2950_s29 = scalar_select %p44_p11, %s2737_s27, %s46_s23  }
  0x5b   : > { %p55_p2 = por %p54_p13, %p53_p12  ;;  %p2954_p5 = por %p3471_p1, %p59_p0 }
  0x5c   : > { %3506 = sst [smem:[#allocation31_spill]] %s2950_s29  ;;  %p309_p9 = scmp.eq.s32.totalorder %s3459_s12, 1 }
  0x5d   : > { %s3507_s16 = scalar_select %p2954_p5, 1, 0 }
  0x5e   : > { %p2297_p4 = scmp.lt.s32.totalorder %s2741_s28, 2  ;;  %s3464_s17 = sand.u32 1, %s2737_s27  }
  0x5f   : > { %p2963_p10 = por %p303_p7, %p53_p12  ;;  %p2967_p3 = por %p309_p9, %p59_p0 }
  0x60   : > { %s2973_s8 = sshll.u32 %s3464_s17, 3  ;;  %s2976_s10 = sshll.u32 %s2741_s28, 7 }
  0x61   : > { %s3508_s19 = scalar_select %p2963_p10, 1, 0 }
  0x62   : > { %s3510_s30 = scalar_select %p2967_p3, 1, 0 }
  0x63   : > { %3509 = sst [smem:[#allocation32_spill]] %s3508_s19  ;;  %p2978_p11 = pnand %p2297_p4, %p55_p2 }
  0x64   : > { %3511 = sst [smem:[#allocation33_spill]] %s3510_s30  ;;  %s471_s23 = sand.u32 1, %s2741_s28  }
  0x65   : > { %s3512_s22 = scalar_select %p2978_p11, 1, 0 }
  0x66   : > { %s3513_s1 = sld [smem:[#allocation34_spill]]  ;;  %s475_s17 = scalar_lea.vmem [#allocation5], %s2973_s8 }
  0x67   : > { %s482_s3 = sshll.u32 %s475_s17, 4  ;;  %s2747_s5 = smov [#allocation10]   ;;  %s2990_s3 = int_to_ptr.vmem [resolvable:$true] %s482_s3 }
  0x68   : > { %s2992_s29 = sshll.u32 %s2747_s5, 4  ;;  %s2994_s13 = scalar_lea.sflag [#allocation6], %s471_s23  ;;  %s394_s29 = int_to_ptr.vmem [resolvable:$true] %s2992_s29 }
  0x69   : > { %p3000_p13 = pneg %p2978_p11 }
  0x6b   : > { %s3514_s20 = scalar_select %p3000_p13, 1, 0 }
  0x6c   : > { %s2987_s21 = scalar_lea.hbm %s3513_s1, %s2976_s10  ;;  %s2430_s28 = scalar_lea.hbm %s3513_s1, 256 }
  0x6d   : > { %s2425_s30 = scalar_lea.hbm %s2987_s21, 128  ;;  %p2431_p7 = scmp.lt.u32.totalorder %s2987_s21, %s3513_s1 }
  0x6e   : > { %p2426_p12 = scmp.ne.s32.totalorder %s2987_s21, %s2425_s30  ;;  %p2432_p9 = scmp.lt.u32.totalorder %s2430_s28, %s2425_s30 }
  0x6f   : > { %p2434_p1 = scmp.lt.u32.totalorder %s2425_s30, %s2987_s21 }
  0x70   : > { %p2428_p0 = pnand %p3000_p13, %p2426_p12  ;;  %p2433_p4 = por %p2432_p9, %p2431_p7 }
  0x72   : > { %p2429_p2 = pneg %p2428_p0  ;;  %p2435_p3 = por %p2434_p1, %p2433_p4 }
  0x74   : > { %p2436_p10 = pnand %p2435_p3, %p2429_p2 }
  0x76   : > { %2439 = shalt.err (!%p2436_p10)
}
  0x77   : > { %s2440_s23 = scalar_lea.vmem %s2990_s3, 128  ;;  %s2748_s12 = smov [#allocation5]  }
  0x78   : > { %p2441_p12 = scmp.ne.s32.totalorder %s2990_s3, %s2440_s23  ;;  %s2445_s17 = sshll.u32 %s2748_s12, 4  ;;  %s2446_s17 = int_to_ptr.vmem [resolvable:$false] %s2445_s17 }
  0x79   : > { %s2447_s25 = scalar_lea.vmem %s2446_s17, 256  ;;  %p2448_p6 = scmp.lt.s32.totalorder %s2990_s3, %s2446_s17 }
  0x7a   : > { %p2443_p0 = pnand %p2441_p12, %p3000_p13  ;;  %p2449_p8 = scmp.lt.s32.totalorder %s2447_s25, %s2440_s23 }
  0x7c   : > { %p2444_p5 = pneg %p2443_p0  ;;  %p2450_p7 = por %p2449_p8, %p2448_p6 }
  0x7e   : > { %p2451_p9 = pnand %p2450_p7, %p2444_p5 }
  0x80   : > { %2454 = shalt.err (!%p2451_p9)
}
  0x81   : > { %2278 = dma.hbm_to_vmem [thread:$0]  (!%p2978_p11), %s2987_s21, 128, %s2990_s3, %s2994_s13  }
  0x82   : > { %s2455_s5 = scalar_lea.hbm %s3446_s4, 512  ;;  %p3515_p3 = scmp.ne.s32.totalorder %s3503_s24, 0 }
  0x83   : > { %p2456_p1 = scmp.ne.s32.totalorder %s3446_s4, %s2455_s5  ;;  %p2462_p5 = scmp.lt.u32.totalorder %s2455_s5, %s3446_s4 }
  0x85   : > { %p2458_p6 = pnand %p2456_p1, %p3515_p3 }
  0x87   : > { %p2459_p8 = pneg %p2458_p6 }
  0x89   : > { %p2464_p10 = pnand %p2462_p5, %p2459_p8 }
  0x8b   : > { %2467 = shalt.err (!%p2464_p10)
}
  0x8c   : > { %s2468_s25 = scalar_lea.vmem %s394_s29, 512  ;;  %p2476_p0 = scmp.lt.s32.totalorder %s394_s29, %s394_s29 }
  0x8d   : > { %p2469_p2 = scmp.ne.s32.totalorder %s394_s29, %s2468_s25  ;;  %p2477_p7 = scmp.lt.s32.totalorder %s2468_s25, %s2468_s25 }
  0x8f   : > { %p2471_p4 = pnand %p2469_p2, %p3515_p3  ;;  %p2478_p9 = por %p2477_p7, %p2476_p0 }
  0x91   : > { %p2472_p12 = pneg %p2471_p4 }
  0x93   : > { %p2479_p11 = pnand %p2478_p9, %p2472_p12 }
  0x95   : > { %2482 = shalt.err (!%p2479_p11)
}
  0x96   : > { %p3516_p1 = scmp.ne.s32.totalorder %s3501_s18, 0  ;;  %s3517_s1 = smov 8  }
  0x97   : > { %s3518_s3 = smov 128   ;;  %s2749_s30 = smov [#allocation13]  }
  0x98   : > { %2262 = dma.hbm_to_vmem [thread:$0]  (!%p3516_p1), %s3446_s4, 512, %s394_s29, [#allocation9], %s3518_s3, %s3518_s3, %s3517_s1  }
  0x99   : > { %s420_s5 = sshll.u32 %s2749_s30, 4  ;;  %s2750_s12 = smov [#allocation14]   ;;  %s421_s5 = int_to_ptr.vmem [resolvable:$true] %s420_s5 }
  0x9a   : > { %s430_s23 = sshll.u32 %s2750_s12, 4  ;;  %s2483_s11 = scalar_lea.hbm %s3448_s6, 128  ;;  %s431_s23 = int_to_ptr.vmem [resolvable:$true] %s430_s23 }
  0x9b   : > { %p2484_p11 = scmp.ne.s32.totalorder %s3448_s6, %s2483_s11  ;;  %p2490_p5 = scmp.lt.u32.totalorder %s2483_s11, %s3448_s6 }
  0x9d   : > { %p2486_p6 = pnand %p2484_p11, %p3515_p3 }
  0x9f   : > { %p2487_p8 = pneg %p2486_p6 }
  0xa1   : > { %p2492_p10 = pnand %p2490_p5, %p2487_p8 }
  0xa3   : > { %2495 = shalt.err (!%p2492_p10)
}
  0xa4   : > { %s2496_s29 = scalar_lea.vmem %s421_s5, 128  ;;  %p2504_p0 = scmp.lt.s32.totalorder %s421_s5, %s421_s5 }
  0xa5   : > { %p2497_p2 = scmp.ne.s32.totalorder %s421_s5, %s2496_s29  ;;  %p2505_p7 = scmp.lt.s32.totalorder %s2496_s29, %s2496_s29 }
  0xa7   : > { %p2499_p4 = pnand %p2497_p2, %p3515_p3  ;;  %p2506_p9 = por %p2505_p7, %p2504_p0 }
  0xa9   : > { %p2500_p12 = pneg %p2499_p4 }
  0xab   : > { %p2507_p13 = pnand %p2506_p9, %p2500_p12 }
  0xad   : > { %2510 = shalt.err (!%p2507_p13)
}
  0xae   : > { %2268 = dma.hbm_to_vmem [thread:$0]  (!%p3516_p1), %s3448_s6, 128, %s421_s5, [#allocation12]  }
  0xaf   : > { %s2511_s28 = scalar_lea.hbm %s3449_s7, 512 }
  0xb0   : > { %p2512_p11 = scmp.ne.s32.totalorder %s3449_s7, %s2511_s28  ;;  %p2518_p13 = scmp.lt.u32.totalorder %s2511_s28, %s3449_s7 }
  0xb2   : > { %p2514_p6 = pnand %p2512_p11, %p3515_p3 }
  0xb4   : > { %p2515_p8 = pneg %p2514_p6 }
  0xb6   : > { %p2520_p5 = pnand %p2518_p13, %p2515_p8 }
  0xb8   : > { %2523 = shalt.err (!%p2520_p5)
}
  0xb9   : > { %s2524_s21 = scalar_lea.vmem %s431_s23, 512  ;;  %p2532_p12 = scmp.lt.s32.totalorder %s431_s23, %s431_s23 }
  0xba   : > { %p2525_p10 = scmp.ne.s32.totalorder %s431_s23, %s2524_s21  ;;  %p2533_p0 = scmp.lt.s32.totalorder %s2524_s21, %s2524_s21 }
  0xbc   : > { %p2527_p2 = pnand %p2525_p10, %p3515_p3  ;;  %p2534_p7 = por %p2533_p0, %p2532_p12 }
  0xbe   : > { %p2528_p4 = pneg %p2527_p2 }
  0xc0   : > { %p2535_p9 = pnand %p2534_p7, %p2528_p4 }
  0xc2   : > { %2538 = shalt.err (!%p2535_p9)
}
  0xc3   : > { %2271 = dma.hbm_to_vmem [thread:$0]  (!%p3516_p1), %s3449_s7, 512, %s431_s23, [#allocation15], %s3518_s3, %s3518_s3, %s3517_s1  }
  0xc4   : > { %s3089_s19 = scalar_lea.hbm %s3442_s0, %s2976_s10  ;;  %s457_s18 = scalar_lea.vmem [#allocation2], %s2973_s8 }
  0xc5   : > { %s464_s11 = sshll.u32 %s457_s18, 4  ;;  %s3098_s30 = scalar_lea.hbm %s3444_s2, %s2976_s10  ;;  %s3092_s11 = int_to_ptr.vmem [resolvable:$true] %s464_s11 }
  0xc6   : > { %s3519_s12 = sand.u32 1, %s2737_s27   ;;  %s2539_s3 = scalar_lea.hbm %s3089_s19, 128 }
  0xc7   : > { %s454_s1 = scalar_lea.sflag [#allocation3], %s3519_s12  ;;  %p2540_p3 = scmp.ne.s32.totalorder %s3089_s19, %s2539_s3 }
  0xc8   : > { %p3520_p1 = scmp.ne.s32.totalorder %s3514_s20, 0  ;;  %s2544_s25 = scalar_lea.hbm %s3442_s0, 256 }
  0xc9   : > { %p2545_p8 = scmp.lt.u32.totalorder %s3089_s19, %s3442_s0  ;;  %p2546_p13 = scmp.lt.u32.totalorder %s2544_s25, %s2539_s3 }
  0xca   : > { %p2542_p11 = pnand %p2540_p3, %p3520_p1  ;;  %p2548_p10 = scmp.lt.u32.totalorder %s2539_s3, %s3089_s19 }
  0xcb   : > { %p2547_p5 = por %p2546_p13, %p2545_p8 }
  0xcc   : > { %p2543_p6 = pneg %p2542_p11 }
  0xcd   : > { %p2549_p2 = por %p2548_p10, %p2547_p5 }
  0xcf   : > { %p2550_p4 = pnand %p2549_p2, %p2543_p6 }
  0xd1   : > { %2553 = shalt.err (!%p2550_p4)
}
  0xd2   : > { %s2554_s10 = scalar_lea.vmem %s3092_s11, 128  ;;  %s2751_s29 = smov [#allocation2]  }
  0xd3   : > { %p2555_p12 = scmp.ne.s32.totalorder %s3092_s11, %s2554_s10  ;;  %s2559_s24 = sshll.u32 %s2751_s29, 4  ;;  %s2560_s24 = int_to_ptr.vmem [resolvable:$false] %s2559_s24 }
  0xd4   : > { %s2561_s9 = scalar_lea.vmem %s2560_s24, 256  ;;  %p2562_p9 = scmp.lt.s32.totalorder %s3092_s11, %s2560_s24 }
  0xd5   : > { %p2557_p0 = pnand %p2555_p12, %p3520_p1  ;;  %p2563_p3 = scmp.lt.s32.totalorder %s2561_s9, %s2554_s10 }
  0xd7   : > { %p2558_p7 = pneg %p2557_p0  ;;  %p2564_p11 = por %p2563_p3, %p2562_p9 }
  0xd9   : > { %p2565_p8 = pnand %p2564_p11, %p2558_p7 }
  0xdb   : > { %2568 = shalt.err (!%p2565_p8)
}
  0xdc   : > { %p3521_p6 = scmp.ne.s32.totalorder %s3512_s22, 0  ;;  %s493_s18 = scalar_lea.vmem [#allocation7], %s2973_s8 }
  0xdd   : > { %s500_s14 = sshll.u32 %s493_s18, 4  ;;  %s2569_s28 = scalar_lea.hbm %s3098_s30, 128  ;;  %s501_s14 = int_to_ptr.vmem [resolvable:$true] %s500_s14 }
  0xde   : > { %2275 = dma.hbm_to_vmem [thread:$0]  (!%p3521_p6), %s3089_s19, 128, %s3092_s11, %s454_s1  }
  0xdf   : > { %p2570_p13 = scmp.ne.s32.totalorder %s3098_s30, %s2569_s28  ;;  %s2574_s23 = scalar_lea.hbm %s3444_s2, 256 }
  0xe0   : > { %p2575_p2 = scmp.lt.u32.totalorder %s3098_s30, %s3444_s2  ;;  %p2576_p4 = scmp.lt.u32.totalorder %s2574_s23, %s2569_s28 }
  0xe1   : > { %p2572_p5 = pnand %p2570_p13, %p3520_p1  ;;  %p2578_p0 = scmp.lt.u32.totalorder %s2569_s28, %s3098_s30 }
  0xe2   : > { %p2577_p12 = por %p2576_p4, %p2575_p2 }
  0xe3   : > { %p2573_p10 = pneg %p2572_p5 }
  0xe4   : > { %p2579_p7 = por %p2578_p0, %p2577_p12 }
  0xe6   : > { %p2580_p9 = pnand %p2579_p7, %p2573_p10 }
  0xe8   : > { %2583 = shalt.err (!%p2580_p9)
}
  0xe9   : > { %s2584_s8 = scalar_lea.vmem %s501_s14, 128  ;;  %s2752_s19 = smov [#allocation7]  }
  0xea   : > { %p2585_p3 = scmp.ne.s32.totalorder %s501_s14, %s2584_s8  ;;  %s2589_s11 = sshll.u32 %s2752_s19, 4  ;;  %s2590_s11 = int_to_ptr.vmem [resolvable:$false] %s2589_s11 }
  0xeb   : > { %s2591_s1 = scalar_lea.vmem %s2590_s11, 256  ;;  %p2592_p13 = scmp.lt.s32.totalorder %s501_s14, %s2590_s11 }
  0xec   : > { %p2587_p11 = pnand %p2585_p3, %p3520_p1  ;;  %p2593_p5 = scmp.lt.s32.totalorder %s2591_s1, %s2584_s8 }
  0xee   : > { %p2588_p8 = pneg %p2587_p11  ;;  %p2594_p6 = por %p2593_p5, %p2592_p13 }
  0xf0   : > { %p2595_p2 = pnand %p2594_p6, %p2588_p8 }
  0xf2   : > { %2598 = shalt.err (!%p2595_p2)
}
  0xf3   : > { %p3522_p4 = scmp.ne.s32.totalorder %s3512_s22, 0  ;;  %p3523_p10 = scmp.ne.s32.totalorder %s3500_s15, 0 }
  0xf4   : > { %s3145_s20 = sand.u32 (!%p3523_p10), 1, %s2733_s26   ;;  %p3524_p1 = scmp.ne.s32.totalorder (!%p3523_p10), %s3507_s16, 0 }
  0xf5   : > { %2281 = dma.hbm_to_vmem [thread:$0]  (!%p3522_p4), %s3098_s30, 128, %s501_s14, %s2994_s13  }
  0xf6   : > { %509 = sbr.rel (%p3523_p10) target bundleno = 1731 (0x6c3), region = 64  ;;  %s3148_s21 = sshll.u32 (!%p3523_p10), %s3145_s20, 3 }
  0xf7   : > { %s512_s5 = scalar_lea.sflag (!%p3523_p10), [#allocation3], %s3145_s20  ;;  %s515_s10 = scalar_lea.vmem (!%p3523_p10), [#allocation2], %s3148_s21 }
  0xfd   : > { %2700 = dma.done.wait (%p3524_p1), %s512_s5, 128  }
  0xfe   : > { %2702 = vsyncadd (%p3524_p1), %s512_s5, 4294967168  ;;  %s3525_s13 = sld [smem:[#allocation29_spill]]  ;;  %s524_s30 = scalar_lea.vmem [#allocation5], %s3148_s21 }
 0x104   : > { %s520_s15 = sand.u32 1, %s3525_s13  }
 0x105   : > { %s521_s22 = scalar_lea.sflag [#allocation6], %s520_s15 }
 0x106   : > { %2704 = dma.done.wait (%p3524_p1), %s521_s22, 256  }
 0x107   : > { %2706 = vsyncadd (%p3524_p1), %s521_s22, 4294967040  ;;  %s533_s29 = scalar_lea.vmem [#allocation7], %s3148_s21  ;;  %p3526_p6 = scmp.eq.s32.totalorder %s3525_s13, 0 }
 0x109   : > { %2708 = dma.done.wait (%p3526_p6), [#allocation9], 1024   ;;  %p3527_p12 = pmov %p3526_p6 }
 0x10a   : > { %p3528_p0 = pmov %p3526_p6 }
 0x10b   : > { %2710 = vsyncadd (%p3527_p12), [#allocation9], 4294966272 }
 0x10c   : > { %2712 = dma.done.wait (%p3528_p0), [#allocation12], 640   ;;  %p3529_p7 = pmov %p3528_p0 }
 0x10d   : > { %p3530_p9 = pmov %p3528_p0 }
 0x10e   : > { %2714 = vsyncadd (%p3529_p7), [#allocation12], 4294966656 }
 0x10f   : > { %2716 = dma.done.wait (%p3530_p9), [#allocation15], 512   ;;  %p3531_p3 = pmov %p3528_p0 }
 0x110   : > { %v2753_v0 = vmov 0.0|0.0   ;;  %vm2754_vm0 = vmmov 0   ;;  %v2755_v1 = vmov 0.0   ;;  %v697_v2 = vld [vmem:[#allocation10] sm:$0xff]  ;;  %v698_v3 = vld [vmem:[#allocation10 + $0x8] sm:$0xff]  ;;  %v699_v7 = vld [vmem:[#allocation10 + $0x10] sm:$0xff] }
 0x111   : > { %2718 = vsyncadd (%p3531_p3), [#allocation15], 4294966784  ;;  %2200 = vmatprep.subr.bf16.mxu1 %v2753_v0  ;;  %2194 = vmatprep.subr.bf16.mxu0 %v2753_v0  ;;  %v619_v4 = vld [vmem:[#allocation8] sm:$0xff]  ;;  %v2201_v5 = vpack.c.bf16 %v698_v3, %v697_v2  ;;  %v620_v6 = vld [vmem:[#allocation8 + $0x8] sm:$0xff]  ;;  %vm623_vm1 = vcmask 261120   ;;  %vm852_vm2 = vcmask 64512  }
 0x112   : > { %2118 = vmatprep.mubr.msk.f32.mxu1 %vm2754_vm0, %v2755_v1  ;;  %2107 = vmatprep.mubr.msk.f32.mxu0 %vm2754_vm0, %v2755_v1  ;;  %v700_v8 = vld [vmem:[#allocation10 + $0x18] sm:$0xff]  ;;  %v2195_v9 = vpack.c.bf16 %v620_v6, %v619_v4  ;;  %v621_v10 = vld [vmem:[#allocation8 + $0x10] sm:$0xff]  ;;  %v617_v14 = vld [vmem:[%s524_s30] sm:$0xff]  ;;  %s2756_s16 = smov 112   ;;  %s2757_s24 = smov 120   ;;  %vm1538_vm3 = vcmask 130048  }
 0x113   : > { %v622_v11 = vld [vmem:[#allocation8 + $0x18] sm:$0xff]  ;;  %2202 = vmatpush3.bf16.msra.mxu1 %v2201_v5  ;;  %v2204_v12 = vpack.c.bf16 %v700_v8, %v699_v7  ;;  %v774_v16 = vld [vmem:[#allocation11] sm:$0xff]  ;;  %v775_v17 = vld [vmem:[#allocation11 + $0x8] sm:$0xff]  ;;  %s2758_s9 = smov 104   ;;  %s2759_s18 = smov 8   ;;  %vm1540_vm4 = vcmask 195584  }
 0x114   : > { %2196 = vmatpush3.bf16.msra.mxu0 %v2195_v9  ;;  %2203 = vmatprep.subr.bf16.mxu1 %v2753_v0  ;;  %v2198_v13 = vpack.c.bf16 %v622_v11, %v621_v10  ;;  %v616_v15 = vld [vmem:[%s515_s10] sm:$0xff]  ;;  %v2207_v19 = vpack.c.bf16 %v775_v17, %v774_v16  ;;  %v851_v35 = vld [vmem:[#allocation13] sm:$0xff]  ;;  %s2023_s14 = sshll.u32 %s3145_s20, 5  ;;  %s3532_s23 = sld [smem:[#allocation38_spill]] }
 0x115   : > { %2197 = vmatprep.subr.bf16.mxu0 %v2753_v0  ;;  %v776_v18 = vld [vmem:[#allocation11 + $0x10] sm:$0xff]  ;;  %v777_v20 = vld [vmem:[#allocation11 + $0x18] sm:$0xff]  ;;  %s3258_s28 = scalar_lea.vmem [#allocation16], %s2023_s14  ;;  %s2760_s5 = smov 16  }
 0x116   : > { %v2210_v21 = vpack.c.bf16 %v777_v20, %v776_v18  ;;  %v618_v22 = vld [vmem:[%s533_s29] sm:$0xff]  ;;  %s2761_s10 = smov 24   ;;  %s3533_s22 = sld [smem:[#allocation32_spill]] }
 0x117   : > { %2205 = vmatpush3.bf16.msra.mxu1 %v2204_v12  ;;  %s2057_s30 = sshll.u32 %s3525_s13, 9  ;;  %s1749_s14 = sshll.u32 %s3258_s28, 4  ;;  %s3317_s14 = int_to_ptr.vmem [resolvable:$true] %s1749_s14 }
 0x118   : > { %2199 = vmatpush3.bf16.msra.mxu0 %v2198_v13  ;;  %2132 = vmatprep.subr.mxu1 %v2755_v1  ;;  %s1726_s12 = scalar_lea.sflag [#allocation4], %s3145_s20  ;;  %s2599_s3 = scalar_lea.vmem %s3317_s14, 512 }
 0x119   : > { %2206 = vmatprep.subr.bf16.mxu0 %v2753_v0  ;;  %p2600_p11 = scmp.ne.s32.totalorder %s3317_s14, %s2599_s3  ;;  %s2762_s17 = smov [#allocation16]  }
 0x11a   : > { %2119 = vmatmul.mubr.msk.f32.vlgmr.msra.gmra.mrb[0].mxu1 %vm623_vm1, %v617_v14  ;;  %s2603_s25 = sshll.u32 %s2762_s17, 4  ;;  %s2604_s25 = int_to_ptr.vmem [resolvable:$false] %s2603_s25 }
 0x11b   : > { %2108 = vmatmul.mubr.msk.f32.vlgmr.msra.gmra.mrb[0].mxu0 %vm623_vm1, %v616_v15  ;;  %2134 = vmatprep.mubr.msk.f32.mxu1 %vm2754_vm0, %v2755_v1  ;;  %s2605_s8 = scalar_lea.vmem %s2604_s25, 1024  ;;  %p2606_p2 = scmp.lt.s32.totalorder %s3317_s14, %s2604_s25 }
 0x11c   : > { %2129 = vmatprep.mubr.msk.f32.mxu0 %vm2754_vm0, %v2755_v1  ;;  %2208 = vmatpush3.bf16.msra.mxu0 %v2207_v19  ;;  %p3535_p8 = scmp.ne.s32.totalorder %s3533_s22, 0  ;;  %p2607_p4 = scmp.lt.s32.totalorder %s2605_s8, %s2599_s3 }
 0x11d   : > { %2209 = vmatprep.subr.bf16.mxu0 %v2753_v0 }
 0x11e   : > { %p2601_p13 = pnand %p2600_p11, %p3535_p8  ;;  %p2608_p10 = por %p2607_p4, %p2606_p2 }
 0x120   : > { %2211 = vmatpush3.bf16.msra.mxu0 %v2210_v21  ;;  %p2602_p5 = pneg %p2601_p13 }
 0x121   : > { %2142 = vmatprep.subr.mxu0 %v2755_v1 }
 0x122   : > { %p2609_p1 = pnand %p2608_p10, %p2602_p5 }
 0x123   : > { %2130 = vmatmul.mubr.msk.f32.vlgmr.msra.gmra.mrb[2].mxu0 %vm623_vm1, %v618_v22 }
 0x124   : > { %2144 = vmatprep.mubr.msk.f32.mxu0 %vm2754_vm0, %v2755_v1 }
 0x1ed   : > { %v770_v23 = vpop.f32.mrb[0].mxu1 }
 0x1ee   : > { %1189 = vrot.lane.b32.xlu1 %v770_v23, %s2756_s16  ;;  %1020 = vrot.lane.b32.xlu0 %v770_v23, %s2757_s24  ;;  %v2120_v24 = vpop.f32.mrb[1].mxu1  ;;  %v3206_v25 = vpop.f32.mrb[0].mxu0 }
 0x1ef   : > { %2133 = vmatpush3.xpose.msk.msra.mxu1 %vm852_vm2, %v770_v23  ;;  %v2109_v26 = vpop.f32.mrb[1].mxu0 }
 0x1f0   : > { %2137 = vmatprep.subr.mxu1 %v2755_v1 }
 0x1f2   : > { %2135 = vmatmul.mubr.msk.f32.vlgmr.msra.gmra.mrb[2].mxu1 %vm852_vm2, %v3206_v25  ;;  %1187 = vrot.lane.b32.xlu1 %v3206_v25, %s2756_s16 }
 0x1f3   : > { %1018 = vrot.lane.b32.xlu0 %v3206_v25, %s2757_s24  ;;  %2139 = vmatprep.mubr.msk.f32.mxu1 %vm2754_vm0, %v2755_v1 }
 0x1f6   : > { %1356 = vrot.lane.b32.xlu1 %v3206_v25, %s2758_s9  ;;  %v847_v33 = vpop.f32.mrb[2].mxu0 }
 0x1f7   : > { %1358 = vrot.lane.b32.xlu0 %v770_v23, %s2758_s9  ;;  %v2131_v34 = vpop.f32.mrb[3].mxu0 }
 0x260   : > { %v1021_v27 = vpop.permute.xlu0 %1020  ;;  %v1190_v28 = vpop.permute.xlu1 %1189 }
 0x261   : > { %2143 = vmatpush3.xpose.msk.msra.mxu0 %vm852_vm2, %v1021_v27 }
 0x262   : > { %2152 = vmatprep.subr.mxu0 %v2755_v1 }
 0x264   : > { %v3227_v30 = vpop.permute.xlu1 %1187 }
 0x265   : > { %v3223_v29 = vpop.permute.xlu0 %1018 }
 0x266   : > { %2145 = vmatmul.mubr.msk.f32.vlgmr.msra.gmra.mrb[4].mxu0 %vm852_vm2, %v3223_v29 }
 0x267   : > { %2153 = vmatpush3.xpose.msk.msra.mxu0 %vm852_vm2, %v1190_v28  ;;  %2154 = vmatprep.mubr.msk.f32.mxu0 %vm2754_vm0, %v2755_v1 }
 0x268   : > { %2162 = vmatprep.subr.mxu0 %v2755_v1  ;;  %v1357_v32 = vpop.permute.xlu1 %1356 }
 0x269   : > { %v1359_v31 = vpop.permute.xlu0 %1358 }
 0x26a   : > { %2155 = vmatmul.mubr.msk.f32.vlgmr.msra.gmra.mrb[6].mxu0 %vm852_vm2, %v3227_v30 }
 0x26b   : > { %2163 = vmatpush3.xpose.msk.msra.mxu0 %vm852_vm2, %v1359_v31  ;;  %2164 = vmatprep.mubr.msk.f32.mxu0 %vm2754_vm0, %v2755_v1 }
 0x26c   : > { %2212 = vmatprep.subr.bf16.mxu0 %v2753_v0 }
 0x26e   : > { %2165 = vmatmul.mubr.msk.f32.vlgmr.msra.gmra.mrb[8].mxu0 %vm852_vm2, %v1357_v32 }
 0x26f   : > { %2180 = vmatprep.mubr.msk.f32.mxu0 %vm2754_vm0, %v2755_v1 }
 0x2c5   : > { %v925_v36 = vpop.f32.mrb[2].mxu1 }
 0x2c6   : > { %v926_v37 = vadd.f32 %v925_v36, %v851_v35  ;;  %v2136_v38 = vpop.f32.mrb[3].mxu1  ;;  %v1558_v36 = vld [vmem:[#allocation14 + $0x18] sm:$0xff] }
 0x2c8   : > { %v929_v39 = vsel %vm852_vm2, %v926_v37, -inf }
 0x2c9   : > { %930 = vmax.xlane.f32.xlu0 %v929_v39 }
 0x339   : > { %v1092_v40 = vpop.f32.mrb[4].mxu0 }
 0x33a   : > { %v1093_v41 = vadd.f32 %v1092_v40, %v851_v35  ;;  %v2146_v42 = vpop.f32.mrb[5].mxu0  ;;  %v1642_v40 = vld [vmem:[%s3532_s23 + $0x10] sm:$0xff] }
 0x33c   : > { %v1096_v43 = vsel %vm852_vm2, %v1093_v41, -inf }
 0x33d   : > { %1097 = vmax.xlane.f32.xlu1 %v1096_v43  ;;  %v1261_v44 = vpop.f32.mrb[6].mxu0 }
 0x33e   : > { %v1262_v45 = vadd.f32 %v1261_v44, %v851_v35  ;;  %v2156_v46 = vpop.f32.mrb[7].mxu0 }
 0x340   : > { %v1265_v47 = vsel %vm852_vm2, %v1262_v45, -inf }
 0x341   : > { %1266 = vmax.xlane.f32.xlu0 %v1265_v47  ;;  %v1430_v48 = vpop.f32.mrb[8].mxu0 }
 0x342   : > { %v1431_v49 = vadd.f32 %v1430_v48, %v851_v35  ;;  %v2166_v50 = vpop.f32.mrb[9].mxu0  ;;  %v1557_v35 = vld [vmem:[#allocation14 + $0x10] sm:$0xff] }
 0x343   : > { %v2216_v38 = vpack.c.bf16 %v1558_v36, %v1557_v35 }
 0x344   : > { %v1434_v51 = vsel %vm852_vm2, %v1431_v49, -inf }
 0x345   : > { %1435 = vmax.xlane.f32.xlu0 %v1434_v51 }
 0x34e   : > { %941 = vrot.lane.b32.xlu1 %v3206_v25, %s2759_s18 }
 0x356   : > { %v931_v52 = vpop.xlane.xlu0 %930 }
 0x357   : > { %v932_v53 = vsub.f32 %v926_v37, %v931_v52  ;;  %v1640_v37 = vld [vmem:[%s3532_s23] sm:$0xff] }
 0x359   : > { %v933_v54 = vmul.f32 1.442695, %v932_v53 }
 0x35b   : > { %2353 = vpow2.f32 %v933_v54 }
 0x365   : > { %v2354_v55 = vpop.eup %2353 }
 0x366   : > { %v935_v56 = vsel %vm852_vm2, %v2354_v55, 0.0 }
 0x372   : > { %936 = vadd.xlane.f32.xlu1 %v935_v56 }
 0x3ca   : > { %v1098_v57 = vpop.xlane.xlu1 %1097 }
 0x3cb   : > { %v1099_v58 = vsub.f32 %v1093_v41, %v1098_v57  ;;  %v1643_v41 = vld [vmem:[%s3532_s23 + $0x18] sm:$0xff] }
 0x3cc   : > { %v2222_v42 = vpack.c.bf16 %v1643_v41, %v1642_v40 }
 0x3cd   : > { %v1100_v59 = vmul.f32 1.442695, %v1099_v58 }
 0x3ce   : > { %v942_v60 = vpop.permute.xlu1 %941  ;;  %v1267_v61 = vpop.xlane.xlu0 %1266 }
 0x3cf   : > { %2355 = vpow2.f32 %v1100_v59  ;;  %v944_v62 = vsel %vm852_vm2, %v847_v33, %v942_v60  ;;  %v1268_v63 = vsub.f32 %v1262_v45, %v1267_v61 }
 0x3d0   : > { %2138 = vmatpush3.msra.mxu1 %v944_v62 }
 0x3d1   : > { %v1269_v2 = vmul.f32 1.442695, %v1268_v63  ;;  %2147 = vmatprep.subr.mxu1 %v2755_v1 }
 0x3d2   : > { %v1436_v3 = vpop.xlane.xlu0 %1435 }
 0x3d3   : > { %2357 = vpow2.f32 %v1269_v2  ;;  %v1437_v4 = vsub.f32 %v1431_v49, %v1436_v3 }
 0x3d5   : > { %v1438_v5 = vmul.f32 1.442695, %v1437_v4 }
 0x3d7   : > { %2359 = vpow2.f32 %v1438_v5 }
 0x3d9   : > { %v2356_v6 = vpop.eup %2355 }
 0x3da   : > { %v1102_v7 = vsel %vm852_vm2, %v2356_v6, 0.0 }
 0x3db   : > { %1103 = vadd.xlane.f32.xlu0 %v1102_v7 }
 0x3dd   : > { %v2358_v8 = vpop.eup %2357 }
 0x3de   : > { %v1271_v9 = vsel %vm852_vm2, %v2358_v8, 0.0 }
 0x3df   : > { %1272 = vadd.xlane.f32.xlu1 %v1271_v9 }
 0x3e1   : > { %v2360_v10 = vpop.eup %2359 }
 0x3e2   : > { %v1440_v11 = vsel %vm852_vm2, %v2360_v10, 0.0 }
 0x3e3   : > { %1441 = vadd.xlane.f32.xlu0 %v1440_v11 }
 0x3f0   : > { %1278 = vrot.lane.b32.xlu1 %v847_v33, %s2756_s16 }
 0x3f4   : > { %1447 = vrot.lane.b32.xlu1 %v847_v33, %s2758_s9 }
 0x3f9   : > { %1110 = vrot.lane.b32.xlu0 %v847_v33, %s2757_s24  ;;  %v1556_v33 = vld [vmem:[#allocation14 + $0x8] sm:$0xff] }
 0x3ff   : > { %v937_v12 = vpop.xlane.xlu1 %936 }
 0x400   : > { %2361 = vrcp.f32 %v937_v12 }
 0x40a   : > { %v2362_v13 = vpop.eup %2361 }
 0x40b   : > { %v939_v14 = vmul.f32 %v2362_v13, %v2354_v55 }
 0x40d   : > { %940 = vst.msk [vmem:[%s3258_s28] sm:$0xff] %vm852_vm2, %v939_v14  ;;  %2140 = vmatmul.mubr.msk.f32.vlgmr.msra.gmra.mrb[4].mxu1 %vm852_vm2, %v939_v14 }
 0x40e   : > { %2149 = vmatprep.mubr.msk.f32.mxu1 %vm2754_vm0, %v2755_v1 }
 0x468   : > { %v1104_v15 = vpop.xlane.xlu0 %1103 }
 0x469   : > { %2363 = vrcp.f32 %v1104_v15 }
 0x46c   : > { %v1273_v16 = vpop.xlane.xlu1 %1272 }
 0x46d   : > { %2365 = vrcp.f32 %v1273_v16 }
 0x470   : > { %v1442_v17 = vpop.xlane.xlu0 %1441  ;;  %v1279_v18 = vpop.permute.xlu1 %1278 }
 0x471   : > { %2367 = vrcp.f32 %v1442_v17  ;;  %v1282_v24 = vsel %vm852_vm2, %v1279_v18, %v3223_v29 }
 0x473   : > { %v2364_v19 = vpop.eup %2363 }
 0x474   : > { %v1106_v20 = vmul.f32 %v2364_v19, %v2356_v6  ;;  %v1111_v21 = vpop.permute.xlu0 %1110  ;;  %v1448_v27 = vpop.permute.xlu1 %1447 }
 0x475   : > { %v1113_v22 = vsel %vm852_vm2, %v1111_v21, %v3206_v25  ;;  %v1451_v28 = vsel %vm852_vm2, %v1448_v27, %v3227_v30  ;;  %v1555_v30 = vld [vmem:[#allocation14] sm:$0xff] }
 0x476   : > { %2034 = vst.msk [vmem:[%s3258_s28 + $0x8] sm:$0xff] %vm852_vm2, %v1106_v20  ;;  %2148 = vmatpush3.msra.mxu1 %v1113_v22  ;;  %v2213_v34 = vpack.c.bf16 %v1556_v33, %v1555_v30 }
 0x477   : > { %v2366_v23 = vpop.eup %2365  ;;  %2150 = vmatmul.mubr.msk.f32.vlgmr.msra.gmra.mrb[6].mxu1 %vm852_vm2, %v1106_v20  ;;  %2157 = vmatprep.subr.mxu1 %v2755_v1 }
 0x478   : > { %v1275_v26 = vmul.f32 %v2366_v23, %v2358_v8  ;;  %2158 = vmatpush3.msra.mxu1 %v1282_v24  ;;  %2159 = vmatprep.mubr.msk.f32.mxu1 %vm2754_vm0, %v2755_v1 }
 0x479   : > { %2167 = vmatprep.subr.mxu1 %v2755_v1  ;;  %2214 = vmatpush3.bf16.msra.mxu0 %v2213_v34 }
 0x47a   : > { %2038 = vst.msk [vmem:[%s3258_s28 + $0x10] sm:$0xff] %vm852_vm2, %v1275_v26  ;;  %2215 = vmatprep.subr.bf16.mxu0 %v2753_v0 }
 0x47b   : > { %v2368_v25 = vpop.eup %2367  ;;  %2160 = vmatmul.mubr.msk.f32.vlgmr.msra.gmra.mrb[8].mxu1 %vm852_vm2, %v1275_v26 }
 0x47c   : > { %v1444_v29 = vmul.f32 %v2368_v25, %v2360_v10  ;;  %2168 = vmatpush3.msra.mxu1 %v1451_v28  ;;  %2169 = vmatprep.mubr.msk.f32.mxu1 %vm2754_vm0, %v2755_v1 }
 0x47d   : > { %2218 = vmatprep.subr.bf16.mxu1 %v2753_v0  ;;  %2217 = vmatpush3.bf16.msra.mxu0 %v2216_v38 }
 0x47e   : > { %2042 = vst.msk [vmem:[%s3258_s28 + $0x18] sm:$0xff] %vm852_vm2, %v1444_v29 }
 0x47f   : > { %2170 = vmatmul.mubr.msk.f32.vlgmr.msra.gmra.mrb[10].mxu1 %vm852_vm2, %v1444_v29 }
 0x480   : > { %2191 = vmatprep.mubr.msk.f32.mxu1 %vm2754_vm0, %v2755_v1  ;;  %v1641_v1 = vld [vmem:[%s3532_s23 + $0x8] sm:$0xff] }
 0x481   : > { %v2219_v39 = vpack.c.bf16 %v1641_v1, %v1640_v37 }
 0x483   : > { %2220 = vmatpush3.bf16.msra.mxu1 %v2219_v39 }
 0x484   : > { %2221 = vmatprep.subr.bf16.mxu1 %v2753_v0 }
 0x487   : > { %2223 = vmatpush3.bf16.msra.mxu1 %v2222_v42 }
 0x4e0   : > { %v1014_v31 = vpop.f32.mrb[4].mxu1 }
 0x4e1   : > { %v2141_v32 = vpop.f32.mrb[5].mxu1  ;;  %1526 = vrot.lane.b32.xlu0 %v1014_v31, %s2757_s24  ;;  %s3534_s24 = sld [smem:[#allocation40_spill]] }
 0x4e7   : > { %s3314_s9 = scalar_lea.hbm %s3534_s24, %s2057_s30 }
 0x54a   : > { %v1183_v43 = vpop.f32.mrb[6].mxu1 }
 0x54b   : > { %1543 = vrot.lane.b32.xlu0 %v1183_v43, %s2759_s18  ;;  %v2151_v44 = vpop.f32.mrb[7].mxu1 }
 0x54e   : > { %v1352_v45 = vpop.f32.mrb[8].mxu1 }
 0x54f   : > { %1546 = vrot.lane.b32.xlu0 %v1352_v45, %s2760_s5  ;;  %1530 = vrot.lane.b32.xlu1 %v1352_v45, %s2759_s18  ;;  %v2161_v46 = vpop.f32.mrb[9].mxu1 }
 0x552   : > { %v1521_v47 = vpop.f32.mrb[10].mxu1 }
 0x553   : > { %1534 = vrot.lane.b32.xlu1 %v1521_v47, %s2760_s5  ;;  %v2171_v48 = vpop.f32.mrb[11].mxu1  ;;  %v1527_v49 = vpop.permute.xlu0 %1526 }
 0x554   : > { %v1537_v51 = vsel %vm852_vm2, %v1527_v49, %v1183_v43 }
 0x557   : > { %1549 = vrot.lane.b32.xlu1 %v1521_v47, %s2761_s10 }
 0x5bd   : > { %v1544_v0 = vpop.permute.xlu0 %1543 }
 0x5be   : > { %v1552_v56 = vsel %vm852_vm2, %v1014_v31, %v1544_v0 }
 0x5c1   : > { %v1531_v50 = vpop.permute.xlu1 %1530  ;;  %v1547_v54 = vpop.permute.xlu0 %1546 }
 0x5c2   : > { %v1539_v52 = vsel %vm1538_vm3, %v1537_v51, %v1531_v50  ;;  %v1553_v57 = vsel %vm1538_vm3, %v1552_v56, %v1547_v54 }
 0x5c5   : > { %v1535_v53 = vpop.permute.xlu1 %1534 }
 0x5c6   : > { %v1541_v55 = vsel %vm1540_vm4, %v1539_v52, %v1535_v53 }
 0x5c7   : > { %2181 = vmatmul.mubr.msk.f32.vlgmr.msra.gmra.mrb[10].mxu0 %vm623_vm1, %v1541_v55 }
 0x5c9   : > { %v1550_v58 = vpop.permute.xlu1 %1549 }
 0x5ca   : > { %v1554_v59 = vsel %vm1540_vm4, %v1553_v57, %v1550_v58 }
 0x5cb   : > { %2192 = vmatmul.mubr.msk.f32.vlgmr.msra.gmra.mrb[12].mxu1 %vm623_vm1, %v1554_v59 }
 0x5cc   : > { %2612 = shalt.err (!%p2609_p1)
}
 0x5cd   : > { %s2613_s28 = scalar_lea.hbm %s3314_s9, 512  ;;  %s2617_s1 = scalar_lea.hbm %s3534_s24, 1024 }
 0x5ce   : > { %p2614_p6 = scmp.ne.s32.totalorder %s3314_s9, %s2613_s28  ;;  %p2618_p7 = scmp.lt.u32.totalorder %s3314_s9, %s3534_s24 }
 0x5cf   : > { %p2619_p9 = scmp.lt.u32.totalorder %s2617_s1, %s2613_s28  ;;  %p2621_p11 = scmp.lt.u32.totalorder %s2613_s28, %s3314_s9 }
 0x5d0   : > { %p2615_p12 = pnand %p2614_p6, %p3535_p8 }
 0x5d1   : > { %p2620_p3 = por %p2619_p9, %p2618_p7 }
 0x5d2   : > { %p2616_p0 = pneg %p2615_p12 }
 0x5d3   : > { %p2622_p13 = por %p2621_p11, %p2620_p3 }
 0x5d5   : > { %p2623_p5 = pnand %p2622_p13, %p2616_p0 }
 0x5d7   : > { %2626 = shalt.err (!%p2623_p5)
}
 0x5d8   : > { %s2763_s30 = smov 128   ;;  %s3536_s3 = sld [smem:[#allocation37_spill]] }
 0x5d9   : > { %2250 = dma.vmem_to_hbm [thread:$0]  (%p3535_p8), %s3317_s14, 512, %s3314_s9, %s1726_s12, %s2763_s30, %s2763_s30, %s2759_s18  }
 0x5da   : > { %s2053_s17 = sshll.u32 %s3525_s13, 7  ;;  %s608_s25 = scalar_lea.vmem [#allocation17], %s3148_s21 }
 0x5db   : > { %s1765_s8 = sshll.u32 %s608_s25, 4  ;;  %s3537_s19 = sld [smem:[#allocation41_spill]]  ;;  %s3356_s8 = int_to_ptr.vmem [resolvable:$true] %s1765_s8 }
 0x5dc   : > { %s3538_s14 = sld [smem:[#allocation39_spill]]  ;;  %s615_s12 = scalar_lea.vmem [#allocation19], %s3148_s21 }
 0x5dd   : > { %s3364_s1 = sshll.u32 %s615_s12, 4  ;;  %s3369_s5 = scalar_lea.sflag [#allocation18], %s520_s15  ;;  %s1779_s1 = int_to_ptr.vmem [resolvable:$true] %s3364_s1 }
 0x5de   : > { %v2044_v60 = vld [vmem:[%s3536_s3] ss:$0 sm:$0xff]  ;;  %s2627_s10 = scalar_lea.vmem %s3356_s8, 128  ;;  %s2764_s30 = smov [#allocation17]  }
 0x5df   : > { %p2628_p2 = scmp.ne.s32.totalorder %s3356_s8, %s2627_s10  ;;  %s2631_s29 = sshll.u32 %s2764_s30, 4  ;;  %s2632_s29 = int_to_ptr.vmem [resolvable:$false] %s2631_s29 }
 0x5e0   : > { %s2633_s16 = scalar_lea.vmem %s2632_s29, 256  ;;  %p2634_p1 = scmp.lt.s32.totalorder %s3356_s8, %s2632_s29 }
 0x5e1   : > { %s3354_s11 = scalar_lea.hbm %s3537_s19, %s2053_s17  ;;  %p2629_p4 = pnand %p2628_p2, %p3535_p8 }
 0x5e2   : > { %v2046_v2 = vld [vmem:[%s3538_s14] ss:$0 sm:$0xff]  ;;  %p2635_p6 = scmp.lt.s32.totalorder %s2633_s16, %s2627_s10 }
 0x5e3   : > { %p2630_p10 = pneg %p2629_p4 }
 0x5e4   : > { %p2636_p12 = por %p2635_p6, %p2634_p1 }
 0x5e6   : > { %p2637_p0 = pnand %p2636_p12, %p2630_p10 }
 0x69a   : > { %v1635_v61 = vpop.f32.mrb[10].mxu0 }
 0x69b   : > { %v1636_v62 = vadd.f32 %v2044_v60, %v1635_v61  ;;  %v2182_v63 = vpop.f32.mrb[11].mxu0 }
 0x69d   : > { %1639 = vst.msk [vmem:[%s608_s25] sm:$0xff] %vm623_vm1, %v1636_v62 }
 0x69e   : > { %v1720_v3 = vpop.f32.mrb[12].mxu1 }
 0x69f   : > { %2640 = shalt.err (!%p2637_p0)
}
 0x6a0   : > { %s2641_s15 = scalar_lea.hbm %s3354_s11, 128  ;;  %s2645_s20 = scalar_lea.hbm %s3537_s19, 256 }
 0x6a1   : > { %p2642_p7 = scmp.ne.s32.totalorder %s3354_s11, %s2641_s15  ;;  %p2646_p11 = scmp.lt.u32.totalorder %s3354_s11, %s3537_s19 }
 0x6a2   : > { %p2647_p13 = scmp.lt.u32.totalorder %s2645_s20, %s2641_s15  ;;  %p2649_p2 = scmp.lt.u32.totalorder %s2641_s15, %s3354_s11 }
 0x6a3   : > { %p2643_p9 = pnand %p2642_p7, %p3535_p8 }
 0x6a4   : > { %p2648_p5 = por %p2647_p13, %p2646_p11 }
 0x6a5   : > { %p2644_p3 = pneg %p2643_p9 }
 0x6a6   : > { %p2650_p4 = por %p2649_p2, %p2648_p5 }
 0x6a8   : > { %p2651_p10 = pnand %p2650_p4, %p2644_p3 }
 0x6aa   : > { %2654 = shalt.err (!%p2651_p10)
}
 0x6ab   : > { %2251 = dma.vmem_to_hbm [thread:$0]  (%p3535_p8), %s3356_s8, 128, %s3354_s11, %s3369_s5   ;;  %v1721_v4 = vadd.f32 %v2046_v2, %v1720_v3  ;;  %v2193_v5 = vpop.f32.mrb[13].mxu1 }
 0x6ac   : > { %s3539_s10 = sld [smem:[#allocation42_spill]]  ;;  %s2655_s29 = scalar_lea.vmem %s1779_s1, 128 }
 0x6ad   : > { %1724 = vst.msk [vmem:[%s615_s12] sm:$0xff] %vm623_vm1, %v1721_v4  ;;  %p2656_p1 = scmp.ne.s32.totalorder %s1779_s1, %s2655_s29  ;;  %s2765_s16 = smov [#allocation19]  }
 0x6ae   : > { %s2659_s15 = sshll.u32 %s2765_s16, 4  ;;  %s2660_s15 = int_to_ptr.vmem [resolvable:$false] %s2659_s15 }
 0x6af   : > { %p2657_p6 = pnand %p2656_p1, %p3535_p8  ;;  %s2661_s8 = scalar_lea.vmem %s2660_s15, 256 }
 0x6b0   : > { %p2662_p0 = scmp.lt.s32.totalorder %s1779_s1, %s2660_s15  ;;  %p2663_p7 = scmp.lt.s32.totalorder %s2661_s8, %s2655_s29 }
 0x6b1   : > { %p2658_p12 = pneg %p2657_p6 }
 0x6b2   : > { %s3398_s30 = scalar_lea.hbm %s3539_s10, %s2053_s17  ;;  %p2664_p9 = por %p2663_p7, %p2662_p0 }
 0x6b4   : > { %p2665_p3 = pnand %p2664_p9, %p2658_p12 }
 0x6b6   : > { %2668 = shalt.err (!%p2665_p3)
}
 0x6b7   : > { %s2669_s21 = scalar_lea.hbm %s3398_s30, 128  ;;  %s2673_s11 = scalar_lea.hbm %s3539_s10, 256 }
 0x6b8   : > { %p2670_p11 = scmp.ne.s32.totalorder %s3398_s30, %s2669_s21  ;;  %p2674_p2 = scmp.lt.u32.totalorder %s3398_s30, %s3539_s10 }
 0x6b9   : > { %p2675_p4 = scmp.lt.u32.totalorder %s2673_s11, %s2669_s21  ;;  %p2677_p1 = scmp.lt.u32.totalorder %s2669_s21, %s3398_s30 }
 0x6ba   : > { %p2671_p13 = pnand %p2670_p11, %p3535_p8 }
 0x6bb   : > { %p2676_p10 = por %p2675_p4, %p2674_p2 }
 0x6bc   : > { %p2672_p5 = pneg %p2671_p13 }
 0x6bd   : > { %p2678_p6 = por %p2677_p1, %p2676_p10 }
 0x6bf   : > { %p2679_p12 = pnand %p2678_p6, %p2672_p5 }
 0x6c1   : > { %2682 = shalt.err (!%p2679_p12)
}
 0x6c2   : > { %2252 = dma.vmem_to_hbm [thread:$0]  (%p3535_p8), %s1779_s1, 128, %s3398_s30, %s3369_s5  }
 0x6c3 PF: > { %s3540_s25 = sld [smem:[#allocation27_spill]]  ;;  %s3541_s20 = sld [smem:[#allocation33_spill]] }
 0x6c4   : > { %s3542_s28 = sld [smem:[#allocation28_spill]] }
 0x6c9   : > { %s1790_s18 = sand.u32 1, %s3540_s25   ;;  %p3543_p0 = scmp.ne.s32.totalorder %s3541_s20, 0 }
 0x6ca   : > { %p3544_p7 = scmp.ge.s32.totalorder %s3542_s28, 2  ;;  %s1791_s9 = scalar_lea.sflag [#allocation4], %s1790_s18 }
 0x6cc   : > { %p2283_p9 = pnand %p3544_p7, %p3543_p0 }
 0x6ce   : > { %2720 = dma.done.wait (!%p2283_p9), %s1791_s9, 512  }
 0x6cf   : > { %2722 = vsyncadd (!%p2283_p9), %s1791_s9, 4294966784  ;;  %s3545_s14 = sadd.s32 4294967294, %s3542_s28  }
 0x6d0   : > { %s1799_s29 = sand.u32 1, %s3545_s14  }
 0x6d1   : > { %s1800_s16 = scalar_lea.sflag [#allocation18], %s1799_s29 }
 0x6d2   : > { %2724 = dma.done.wait (!%p2283_p9), %s1800_s16, 256  }
 0x6d3   : > { %2726 = vsyncadd (!%p2283_p9), %s1800_s16, 4294967040  ;;  %s3546_s28 = sld [smem:[#allocation30_spill]]  ;;  %s3547_s22 = sld [smem:[#allocation31_spill]] }
 0x6d4   : > { %s3548_s25 = smov %s2733_s26  ;;  %s3549_s26 = smov %s2737_s27 }
 0x6d9   : > { %p36_p8 = scmp.ge.s32.totalorder %s3546_s28, 4   ;;  %s3550_s27 = smov %s3547_s22 }
 0x6db   :  { %38 = sbr.rel (!%p36_p8) target bundleno = 22 (0x16), region = 188 }
 0x6e2   :  { %1814 = vsyncpa [#allocation3], 1 }
 0x6e3   :  { %1816 = vsyncpa [#allocation3 + $0x1], 1 }
 0x6e4   :  { %1817 = vsyncpa [#allocation6], 1 }
 0x6e5   :  { %1819 = vsyncpa [#allocation6 + $0x1], 1 }
 0x6e6   :  { %1820 = vsyncpa [#allocation9], 1 }
 0x6e7   :  { %1821 = vsyncpa [#allocation12], 1 }
 0x6e8   :  { %1822 = vsyncpa [#allocation15], 1 }
 0x6e9   :  { %1823 = vsyncpa [#allocation4], 1 }
 0x6ea   :  { %1825 = vsyncpa [#allocation4 + $0x1], 1 }
 0x6eb   :  { %1826 = vsyncpa [#allocation18], 1 }
 0x6ec   :  { %1828 = vsyncpa [#allocation18 + $0x1], 1 }

</bundles_post_ra>
